<compile_context>
chip_gen: v7x
topology: tpu7x:2x2x1
jax: 0.10.0
libtpu: 0.0.40
codegen_flags: <defaults>
</compile_context>

<pallas_src>
import math
import functools

import jax
import jax.numpy as jnp
from jax.experimental import pallas as pl
from jax.experimental.pallas import tpu as pltpu

_LN_EPS = 1e-5  # torch nn.LayerNorm default


def _layer_norm_f32(x, w, b):
    """LayerNorm with statistics in f32; returns f32."""
    xf = x.astype(jnp.float32)
    mu = jnp.mean(xf, axis=-1, keepdims=True)
    var = jnp.mean(jnp.square(xf - mu), axis=-1, keepdims=True)
    return (xf - mu) * jax.lax.rsqrt(var + _LN_EPS) * w.astype(jnp.float32) \
        + b.astype(jnp.float32)


def _gelu_f32(x):
    # exact erf GELU, matching TransGAN's `gelu` (torch.erf version)
    return x * 0.5 * (1.0 + jax.lax.erf(x / math.sqrt(2.0)))


def _dis_block_kernel(
    x_ref,
    ln1_w_ref, ln1_b_ref,
    qkv_w_ref,
    proj_w_ref, proj_b_ref,
    ln2_w_ref, ln2_b_ref,
    fc1_w_ref, fc1_b_ref,
    fc2_w_ref, fc2_b_ref,
    o_ref,
    *, n_heads, gain, block_b, n_tok):
    # x_ref block: (block_b * n_tok, C) rows; all row-wise ops (LN, QKV, proj,
    # MLP) are done on the full block; attention is done per batch element
    # (row slices are sublane-aligned since n_tok is a multiple of 8 here).
    x = x_ref[...]
    c = x.shape[-1]
    dh = c // n_heads
    scale = float(dh) ** -0.5
    cdt = x.dtype  # MXU operand dtype (bf16 stays bf16; f32 stays f32)

    # ---- LayerNorm 1 (f32 stats) ----
    h = _layer_norm_f32(x, ln1_w_ref[...], ln1_b_ref[...]).astype(cdt)

    # ---- fused QKV projection: single (TM, C) x (C, 3C) matmul ----
    qkv = jnp.dot(h, qkv_w_ref[...], preferred_element_type=jnp.float32)
    q = (qkv[:, 0:c] * scale).astype(cdt)     # fold 1/sqrt(dh) into q once
    k = qkv[:, c:2 * c].astype(cdt)
    v = qkv[:, 2 * c:3 * c].astype(cdt)

    # ---- multi-head attention (per batch element), concat heads ----
    # NOTE: per-head lane slices (dh < 128) are fine at these sizes; for
    # production shapes a head-major layout would avoid cross-lane selects.
    attn_rows = []
    for bi in range(block_b):
        r0 = bi * n_tok
        qb = q[r0:r0 + n_tok]
        kb = k[r0:r0 + n_tok]
        vb = v[r0:r0 + n_tok]
        head_outs = []
        for hd in range(n_heads):
            c0 = hd * dh
            qh = qb[:, c0:c0 + dh]
            kh = kb[:, c0:c0 + dh]
            vh = vb[:, c0:c0 + dh]
            s = jnp.dot(qh, kh.T, preferred_element_type=jnp.float32)
            s = s - jnp.max(s, axis=-1, keepdims=True)
            p = jnp.exp(s)
            p = p * pl.reciprocal(jnp.sum(p, axis=-1, keepdims=True),
                                  approx=True)
            head_outs.append(jnp.dot(p.astype(cdt), vh,
                                     preferred_element_type=jnp.float32))
        attn_rows.append(jnp.concatenate(head_outs, axis=-1))
    attn_cat = attn_rows[0] if block_b == 1 else jnp.concatenate(attn_rows, 0)

    # ---- single full-width output projection ----
    attn_out = jnp.dot(attn_cat.astype(cdt), proj_w_ref[...],
                       preferred_element_type=jnp.float32)
    attn_out = attn_out + proj_b_ref[...].astype(jnp.float32)

    # ---- residual 1 ----
    x1 = gain * (x.astype(jnp.float32) + attn_out)

    # ---- LayerNorm 2 + MLP (GELU fused into the fc1 epilogue) ----
    h2 = _layer_norm_f32(x1, ln2_w_ref[...], ln2_b_ref[...]).astype(cdt)
    h2 = jnp.dot(h2, fc1_w_ref[...], preferred_element_type=jnp.float32)
    h2 = h2 + fc1_b_ref[...].astype(jnp.float32)
    h2 = _gelu_f32(h2)
    mlp_out = jnp.dot(h2.astype(cdt), fc2_w_ref[...],
                      preferred_element_type=jnp.float32)
    mlp_out = mlp_out + fc2_b_ref[...].astype(jnp.float32)

    # ---- residual 2 ----
    x2 = gain * (x1 + mlp_out)
    o_ref[...] = x2.astype(o_ref.dtype)


def dis_block_forward(x, params, *, n_heads, gain=1.0, block_b=None):
    """Pallas implementation of DisBlock.forward (norm='ln', act='gelu', eval)."""
    b, n, c = x.shape
    assert c % n_heads == 0

    # Batch-blocking: amortize per-grid-step overhead while keeping >=2
    # parallel grid steps so both v7x TensorCores get work.
    if block_b is None:
        block_b = max(1, b // 2)
    if b % block_b != 0:
        block_b = 1
    grid_b = b // block_b
    tm = block_b * n

    x2d = x.reshape(b * n, c)

    def full_spec(arr):
        nd = arr.ndim
        return pl.BlockSpec(arr.shape, lambda i, _nd=nd: (0,) * _nd)

    weight_order = [
        "ln1_w", "ln1_b",
        "qkv_w",
        "proj_w", "proj_b",
        "ln2_w", "ln2_b",
        "fc1_w", "fc1_b",
        "fc2_w", "fc2_b",
    ]
    weights = [params[k] for k in weight_order]

    in_specs = [pl.BlockSpec((tm, c), lambda i: (i, 0))]
    in_specs += [full_spec(w) for w in weights]

    out2d = pl.pallas_call(
        functools.partial(_dis_block_kernel, n_heads=n_heads, gain=gain,
                          block_b=block_b, n_tok=n),
        out_shape=jax.ShapeDtypeStruct((b * n, c), x.dtype),
        grid=(grid_b,),
        in_specs=in_specs,
        out_specs=pl.BlockSpec((tm, c), lambda i: (i, 0)),
        compiler_params=pltpu.CompilerParams(
            dimension_semantics=("parallel",),
            vmem_limit_bytes=64 * 1024 * 1024,
        ),
    )(x2d, *weights)
    return out2d.reshape(b, n, c)


# ----------------------------- pure-JAX reference -----------------------------

def _dis_block_ref(x, p, n_heads, gain=1.0):
    hp = jax.lax.Precision.HIGHEST

    def ln(v, w, b_):
        mu = jnp.mean(v, axis=-1, keepdims=True)
        var = jnp.mean((v - mu) ** 2, axis=-1, keepdims=True)
        return (v - mu) * jax.lax.rsqrt(var + _LN_EPS) * w + b_

    bsz, n, c = x.shape
    dh = c // n_heads

    h = ln(x, p["ln1_w"], p["ln1_b"])
    qkv = jnp.einsum("bnc,cd->bnd", h, p["qkv_w"], precision=hp)   # (B,N,3C)
    q, k, v = jnp.split(qkv, 3, axis=-1)
    q = q.reshape(bsz, n, n_heads, dh).transpose(0, 2, 1, 3)
    k = k.reshape(bsz, n, n_heads, dh).transpose(0, 2, 1, 3)
    v = v.reshape(bsz, n, n_heads, dh).transpose(0, 2, 1, 3)
    attn = jnp.einsum("bhnd,bhmd->bhnm", q, k, precision=hp) * (float(dh) ** -0.5)
    attn = jax.nn.softmax(attn, axis=-1)
    o = jnp.einsum("bhnm,bhmd->bhnd", attn, v, precision=hp)
    o = o.transpose(0, 2, 1, 3).reshape(bsz, n, c)
    o = jnp.einsum("bnc,cd->bnd", o, p["proj_w"], precision=hp) + p["proj_b"]
    x1 = gain * (x + o)

    h2 = ln(x1, p["ln2_w"], p["ln2_b"])
    h2 = jnp.einsum("bnc,ch->bnh", h2, p["fc1_w"], precision=hp) + p["fc1_b"]
    h2 = h2 * 0.5 * (1.0 + jax.lax.erf(h2 / math.sqrt(2.0)))
    h2 = jnp.einsum("bnh,hc->bnc", h2, p["fc2_w"], precision=hp) + p["fc2_b"]
    return gain * (x1 + h2)


if __name__ == "__main__":
    # Small shapes consistent with TransGAN's DisBlock: (batch, seq, dim)
    B, N, C = 2, 8, 32
    N_HEADS = 4
    MLP_HIDDEN = int(C * 4.0)

    key = jax.random.PRNGKey(0)
    keys = jax.random.split(key, 12)

    x = jax.random.normal(keys[0], (B, N, C), dtype=jnp.float32)

    def lin_w(k, fan_in, fan_out):
        return jax.random.normal(k, (fan_in, fan_out), jnp.float32) / math.sqrt(fan_in)

    params = {
        "ln1_w": 1.0 + 0.1 * jax.random.normal(keys[1], (1, C), jnp.float32),
        "ln1_b": 0.1 * jax.random.normal(keys[2], (1, C), jnp.float32),
        # fused QKV weight, (C, 3C) = [Wq | Wk | Wv]
        "qkv_w": jnp.concatenate(
            [lin_w(k, C, C) for k in jax.random.split(keys[3], 3)], axis=1),
        "proj_w": lin_w(keys[4], C, C),
        "proj_b": 0.1 * jax.random.normal(keys[5], (1, C), jnp.float32),
        "ln2_w": 1.0 + 0.1 * jax.random.normal(keys[6], (1, C), jnp.float32),
        "ln2_b": 0.1 * jax.random.normal(keys[7], (1, C), jnp.float32),
        "fc1_w": lin_w(keys[8], C, MLP_HIDDEN),
        "fc1_b": 0.1 * jax.random.normal(keys[9], (1, MLP_HIDDEN), jnp.float32),
        "fc2_w": lin_w(keys[10], MLP_HIDDEN, C),
        "fc2_b": 0.1 * jax.random.normal(keys[11], (1, C), jnp.float32),
    }

    y = dis_block_forward(x, params, n_heads=N_HEADS, gain=1.0)
    jax.block_until_ready(y)

    y_ref = _dis_block_ref(x, params, N_HEADS, gain=1.0)
    jax.block_until_ready(y_ref)

    assert y.shape == x.shape
    err = jnp.max(jnp.abs(y - y_ref))
    # approx=True reciprocal in the softmax introduces ~1e-4 relative error
    assert jnp.allclose(y, y_ref, atol=1e-2, rtol=1e-2), f"max abs err = {err}"

    print("KERNEL_OK")
</pallas_src>

<mosaic_0001>
module attributes {stable_mosaic.version = 11 : i64} {
  func.func @_dis_block_kernel(%arg0: i32, %arg1: memref<8x32xf32, #tpu.memory_space<vmem>>, %arg2: memref<1x32xf32, #tpu.memory_space<vmem>>, %arg3: memref<1x32xf32, #tpu.memory_space<vmem>>, %arg4: memref<32x96xf32, #tpu.memory_space<vmem>>, %arg5: memref<32x32xf32, #tpu.memory_space<vmem>>, %arg6: memref<1x32xf32, #tpu.memory_space<vmem>>, %arg7: memref<1x32xf32, #tpu.memory_space<vmem>>, %arg8: memref<1x32xf32, #tpu.memory_space<vmem>>, %arg9: memref<32x128xf32, #tpu.memory_space<vmem>>, %arg10: memref<1x128xf32, #tpu.memory_space<vmem>>, %arg11: memref<128x32xf32, #tpu.memory_space<vmem>>, %arg12: memref<1x32xf32, #tpu.memory_space<vmem>>, %arg13: memref<8x32xf32, #tpu.memory_space<vmem>>) attributes {dimension_semantics = [#tpu.dimension_semantics<parallel>], iteration_bounds = array<i64: 2>, scalar_prefetch = 0 : i64, scratch_operands = 0 : i64, tpu.core_type = #tpu.core_type<tc>, window_params = [{transform_indices = @transform_0, window_bounds = array<i64: 8, 32>}, {pipeline_mode = #tpu.pipeline_mode<synchronous>, transform_indices = @transform_1, window_bounds = array<i64: 1, 32>}, {pipeline_mode = #tpu.pipeline_mode<synchronous>, transform_indices = @transform_2, window_bounds = array<i64: 1, 32>}, {pipeline_mode = #tpu.pipeline_mode<synchronous>, transform_indices = @transform_3, window_bounds = array<i64: 32, 96>}, {pipeline_mode = #tpu.pipeline_mode<synchronous>, transform_indices = @transform_4, window_bounds = array<i64: 32, 32>}, {pipeline_mode = #tpu.pipeline_mode<synchronous>, transform_indices = @transform_5, window_bounds = array<i64: 1, 32>}, {pipeline_mode = #tpu.pipeline_mode<synchronous>, transform_indices = @transform_6, window_bounds = array<i64: 1, 32>}, {pipeline_mode = #tpu.pipeline_mode<synchronous>, transform_indices = @transform_7, window_bounds = array<i64: 1, 32>}, {pipeline_mode = #tpu.pipeline_mode<synchronous>, transform_indices = @transform_8, window_bounds = array<i64: 32, 128>}, {pipeline_mode = #tpu.pipeline_mode<synchronous>, transform_indices = @transform_9, window_bounds = array<i64: 1, 128>}, {pipeline_mode = #tpu.pipeline_mode<synchronous>, transform_indices = @transform_10, window_bounds = array<i64: 128, 32>}, {pipeline_mode = #tpu.pipeline_mode<synchronous>, transform_indices = @transform_11, window_bounds = array<i64: 1, 32>}, {transform_indices = @transform_12, window_bounds = array<i64: 8, 32>}]} {
    %c0 = arith.constant 0 : index
    %c0_0 = arith.constant 0 : index
    %0 = vector.load %arg1[%c0, %c0_0] : memref<8x32xf32, #tpu.memory_space<vmem>>, vector<8x32xf32>
    %c0_1 = arith.constant 0 : index
    %c0_2 = arith.constant 0 : index
    %1 = vector.load %arg2[%c0_1, %c0_2] : memref<1x32xf32, #tpu.memory_space<vmem>>, vector<1x32xf32>
    %c0_3 = arith.constant 0 : index
    %c0_4 = arith.constant 0 : index
    %2 = vector.load %arg3[%c0_3, %c0_4] : memref<1x32xf32, #tpu.memory_space<vmem>>, vector<1x32xf32>
    %cst = arith.constant dense<0.000000e+00> : vector<8xf32>
    %3 = vector.multi_reduction <add>, %0, %cst [1] : vector<8x32xf32> to vector<8xf32>
    %4 = vector.shape_cast %3 : vector<8xf32> to vector<8x1xf32>
    %cst_5 = arith.constant 3.200000e+01 : f32
    %5 = vector.broadcast %cst_5 : f32 to vector<8x1xf32>
    %6 = arith.divf %4, %5 : vector<8x1xf32>
    %7 = vector.broadcast %6 : vector<8x1xf32> to vector<8x32xf32>
    %8 = arith.subf %0, %7 : vector<8x32xf32>
    %9 = arith.mulf %8, %8 : vector<8x32xf32>
    %cst_6 = arith.constant dense<0.000000e+00> : vector<8xf32>
    %10 = vector.multi_reduction <add>, %9, %cst_6 [1] : vector<8x32xf32> to vector<8xf32>
    %11 = vector.shape_cast %10 : vector<8xf32> to vector<8x1xf32>
    %cst_7 = arith.constant 3.200000e+01 : f32
    %12 = vector.broadcast %cst_7 : f32 to vector<8x1xf32>
    %13 = arith.divf %11, %12 : vector<8x1xf32>
    %14 = vector.broadcast %6 : vector<8x1xf32> to vector<8x32xf32>
    %15 = arith.subf %0, %14 : vector<8x32xf32>
    %cst_8 = arith.constant 9.99999974E-6 : f32
    %16 = vector.broadcast %cst_8 : f32 to vector<8x1xf32>
    %17 = arith.addf %13, %16 : vector<8x1xf32>
    %18 = math.rsqrt %17 : vector<8x1xf32>
    %19 = vector.broadcast %18 : vector<8x1xf32> to vector<8x32xf32>
    %20 = arith.mulf %15, %19 : vector<8x32xf32>
    %21 = vector.broadcast %1 : vector<1x32xf32> to vector<8x32xf32>
    %22 = arith.mulf %20, %21 : vector<8x32xf32>
    %23 = vector.broadcast %2 : vector<1x32xf32> to vector<8x32xf32>
    %24 = arith.addf %22, %23 : vector<8x32xf32>
    %c0_9 = arith.constant 0 : index
    %c0_10 = arith.constant 0 : index
    %25 = vector.load %arg4[%c0_9, %c0_10] : memref<32x96xf32, #tpu.memory_space<vmem>>, vector<32x96xf32>
    %cst_11 = arith.constant dense<0.000000e+00> : vector<8x96xf32>
    %26 = tpu.matmul %24, %25, %cst_11 {dimension_numbers = #tpu.dot_dimension_numbers<[1], [0], [0], [1], [0, 0, 1, 1], [], []>} : vector<8x32xf32>, vector<32x96xf32>, vector<8x96xf32> -> vector<8x96xf32>
    %27 = vector.extract_strided_slice %26 {offsets = [0, 0], sizes = [8, 32], strides = [1, 1]} : vector<8x96xf32> to vector<8x32xf32>
    %cst_12 = arith.constant 0.353553385 : f32
    %28 = vector.broadcast %cst_12 : f32 to vector<8x32xf32>
    %29 = arith.mulf %27, %28 : vector<8x32xf32>
    %30 = vector.extract_strided_slice %26 {offsets = [0, 32], sizes = [8, 32], strides = [1, 1]} : vector<8x96xf32> to vector<8x32xf32>
    %31 = vector.extract_strided_slice %26 {offsets = [0, 64], sizes = [8, 32], strides = [1, 1]} : vector<8x96xf32> to vector<8x32xf32>
    %32 = vector.extract_strided_slice %29 {offsets = [0, 0], sizes = [8, 8], strides = [1, 1]} : vector<8x32xf32> to vector<8x8xf32>
    %33 = vector.extract_strided_slice %30 {offsets = [0, 0], sizes = [8, 8], strides = [1, 1]} : vector<8x32xf32> to vector<8x8xf32>
    %34 = vector.extract_strided_slice %31 {offsets = [0, 0], sizes = [8, 8], strides = [1, 1]} : vector<8x32xf32> to vector<8x8xf32>
    %35 = tpu.transpose %33, [1, 0] : vector<8x8xf32> -> vector<8x8xf32>
    %cst_13 = arith.constant dense<0.000000e+00> : vector<8x8xf32>
    %36 = tpu.matmul %32, %35, %cst_13 {dimension_numbers = #tpu.dot_dimension_numbers<[1], [0], [0], [1], [0, 0, 1, 1], [], []>} : vector<8x8xf32>, vector<8x8xf32>, vector<8x8xf32> -> vector<8x8xf32>
    %cst_14 = arith.constant dense<0xFF800000> : vector<8xf32>
    %37 = vector.multi_reduction <maximumf>, %36, %cst_14 [1] : vector<8x8xf32> to vector<8xf32>
    %38 = vector.shape_cast %37 : vector<8xf32> to vector<8x1xf32>
    %39 = vector.broadcast %38 : vector<8x1xf32> to vector<8x8xf32>
    %40 = arith.subf %36, %39 : vector<8x8xf32>
    %41 = math.exp %40 : vector<8x8xf32>
    %cst_15 = arith.constant dense<0.000000e+00> : vector<8xf32>
    %42 = vector.multi_reduction <add>, %41, %cst_15 [1] : vector<8x8xf32> to vector<8xf32>
    %43 = vector.shape_cast %42 : vector<8xf32> to vector<8x1xf32>
    %44 = tpu.reciprocal %43 {approx = true} : vector<8x1xf32> -> vector<8x1xf32>
    %45 = vector.broadcast %44 : vector<8x1xf32> to vector<8x8xf32>
    %46 = arith.mulf %41, %45 : vector<8x8xf32>
    %cst_16 = arith.constant dense<0.000000e+00> : vector<8x8xf32>
    %47 = tpu.matmul %46, %34, %cst_16 {dimension_numbers = #tpu.dot_dimension_numbers<[1], [0], [0], [1], [0, 0, 1, 1], [], []>} : vector<8x8xf32>, vector<8x8xf32>, vector<8x8xf32> -> vector<8x8xf32>
    %48 = vector.extract_strided_slice %29 {offsets = [0, 8], sizes = [8, 8], strides = [1, 1]} : vector<8x32xf32> to vector<8x8xf32>
    %49 = vector.extract_strided_slice %30 {offsets = [0, 8], sizes = [8, 8], strides = [1, 1]} : vector<8x32xf32> to vector<8x8xf32>
    %50 = vector.extract_strided_slice %31 {offsets = [0, 8], sizes = [8, 8], strides = [1, 1]} : vector<8x32xf32> to vector<8x8xf32>
    %51 = tpu.transpose %49, [1, 0] : vector<8x8xf32> -> vector<8x8xf32>
    %cst_17 = arith.constant dense<0.000000e+00> : vector<8x8xf32>
    %52 = tpu.matmul %48, %51, %cst_17 {dimension_numbers = #tpu.dot_dimension_numbers<[1], [0], [0], [1], [0, 0, 1, 1], [], []>} : vector<8x8xf32>, vector<8x8xf32>, vector<8x8xf32> -> vector<8x8xf32>
    %cst_18 = arith.constant dense<0xFF800000> : vector<8xf32>
    %53 = vector.multi_reduction <maximumf>, %52, %cst_18 [1] : vector<8x8xf32> to vector<8xf32>
    %54 = vector.shape_cast %53 : vector<8xf32> to vector<8x1xf32>
    %55 = vector.broadcast %54 : vector<8x1xf32> to vector<8x8xf32>
    %56 = arith.subf %52, %55 : vector<8x8xf32>
    %57 = math.exp %56 : vector<8x8xf32>
    %cst_19 = arith.constant dense<0.000000e+00> : vector<8xf32>
    %58 = vector.multi_reduction <add>, %57, %cst_19 [1] : vector<8x8xf32> to vector<8xf32>
    %59 = vector.shape_cast %58 : vector<8xf32> to vector<8x1xf32>
    %60 = tpu.reciprocal %59 {approx = true} : vector<8x1xf32> -> vector<8x1xf32>
    %61 = vector.broadcast %60 : vector<8x1xf32> to vector<8x8xf32>
    %62 = arith.mulf %57, %61 : vector<8x8xf32>
    %cst_20 = arith.constant dense<0.000000e+00> : vector<8x8xf32>
    %63 = tpu.matmul %62, %50, %cst_20 {dimension_numbers = #tpu.dot_dimension_numbers<[1], [0], [0], [1], [0, 0, 1, 1], [], []>} : vector<8x8xf32>, vector<8x8xf32>, vector<8x8xf32> -> vector<8x8xf32>
    %64 = vector.extract_strided_slice %29 {offsets = [0, 16], sizes = [8, 8], strides = [1, 1]} : vector<8x32xf32> to vector<8x8xf32>
    %65 = vector.extract_strided_slice %30 {offsets = [0, 16], sizes = [8, 8], strides = [1, 1]} : vector<8x32xf32> to vector<8x8xf32>
    %66 = vector.extract_strided_slice %31 {offsets = [0, 16], sizes = [8, 8], strides = [1, 1]} : vector<8x32xf32> to vector<8x8xf32>
    %67 = tpu.transpose %65, [1, 0] : vector<8x8xf32> -> vector<8x8xf32>
    %cst_21 = arith.constant dense<0.000000e+00> : vector<8x8xf32>
    %68 = tpu.matmul %64, %67, %cst_21 {dimension_numbers = #tpu.dot_dimension_numbers<[1], [0], [0], [1], [0, 0, 1, 1], [], []>} : vector<8x8xf32>, vector<8x8xf32>, vector<8x8xf32> -> vector<8x8xf32>
    %cst_22 = arith.constant dense<0xFF800000> : vector<8xf32>
    %69 = vector.multi_reduction <maximumf>, %68, %cst_22 [1] : vector<8x8xf32> to vector<8xf32>
    %70 = vector.shape_cast %69 : vector<8xf32> to vector<8x1xf32>
    %71 = vector.broadcast %70 : vector<8x1xf32> to vector<8x8xf32>
    %72 = arith.subf %68, %71 : vector<8x8xf32>
    %73 = math.exp %72 : vector<8x8xf32>
    %cst_23 = arith.constant dense<0.000000e+00> : vector<8xf32>
    %74 = vector.multi_reduction <add>, %73, %cst_23 [1] : vector<8x8xf32> to vector<8xf32>
    %75 = vector.shape_cast %74 : vector<8xf32> to vector<8x1xf32>
    %76 = tpu.reciprocal %75 {approx = true} : vector<8x1xf32> -> vector<8x1xf32>
    %77 = vector.broadcast %76 : vector<8x1xf32> to vector<8x8xf32>
    %78 = arith.mulf %73, %77 : vector<8x8xf32>
    %cst_24 = arith.constant dense<0.000000e+00> : vector<8x8xf32>
    %79 = tpu.matmul %78, %66, %cst_24 {dimension_numbers = #tpu.dot_dimension_numbers<[1], [0], [0], [1], [0, 0, 1, 1], [], []>} : vector<8x8xf32>, vector<8x8xf32>, vector<8x8xf32> -> vector<8x8xf32>
    %80 = vector.extract_strided_slice %29 {offsets = [0, 24], sizes = [8, 8], strides = [1, 1]} : vector<8x32xf32> to vector<8x8xf32>
    %81 = vector.extract_strided_slice %30 {offsets = [0, 24], sizes = [8, 8], strides = [1, 1]} : vector<8x32xf32> to vector<8x8xf32>
    %82 = vector.extract_strided_slice %31 {offsets = [0, 24], sizes = [8, 8], strides = [1, 1]} : vector<8x32xf32> to vector<8x8xf32>
    %83 = tpu.transpose %81, [1, 0] : vector<8x8xf32> -> vector<8x8xf32>
    %cst_25 = arith.constant dense<0.000000e+00> : vector<8x8xf32>
    %84 = tpu.matmul %80, %83, %cst_25 {dimension_numbers = #tpu.dot_dimension_numbers<[1], [0], [0], [1], [0, 0, 1, 1], [], []>} : vector<8x8xf32>, vector<8x8xf32>, vector<8x8xf32> -> vector<8x8xf32>
    %cst_26 = arith.constant dense<0xFF800000> : vector<8xf32>
    %85 = vector.multi_reduction <maximumf>, %84, %cst_26 [1] : vector<8x8xf32> to vector<8xf32>
    %86 = vector.shape_cast %85 : vector<8xf32> to vector<8x1xf32>
    %87 = vector.broadcast %86 : vector<8x1xf32> to vector<8x8xf32>
    %88 = arith.subf %84, %87 : vector<8x8xf32>
    %89 = math.exp %88 : vector<8x8xf32>
    %cst_27 = arith.constant dense<0.000000e+00> : vector<8xf32>
    %90 = vector.multi_reduction <add>, %89, %cst_27 [1] : vector<8x8xf32> to vector<8xf32>
    %91 = vector.shape_cast %90 : vector<8xf32> to vector<8x1xf32>
    %92 = tpu.reciprocal %91 {approx = true} : vector<8x1xf32> -> vector<8x1xf32>
    %93 = vector.broadcast %92 : vector<8x1xf32> to vector<8x8xf32>
    %94 = arith.mulf %89, %93 : vector<8x8xf32>
    %cst_28 = arith.constant dense<0.000000e+00> : vector<8x8xf32>
    %95 = tpu.matmul %94, %82, %cst_28 {dimension_numbers = #tpu.dot_dimension_numbers<[1], [0], [0], [1], [0, 0, 1, 1], [], []>} : vector<8x8xf32>, vector<8x8xf32>, vector<8x8xf32> -> vector<8x8xf32>
    %96 = tpu.concatenate %47, %63, %79, %95 in 1 : vector<8x8xf32>, vector<8x8xf32>, vector<8x8xf32>, vector<8x8xf32> -> vector<8x32xf32>
    %c0_29 = arith.constant 0 : index
    %c0_30 = arith.constant 0 : index
    %97 = vector.load %arg5[%c0_29, %c0_30] : memref<32x32xf32, #tpu.memory_space<vmem>>, vector<32x32xf32>
    %cst_31 = arith.constant dense<0.000000e+00> : vector<8x32xf32>
    %98 = tpu.matmul %96, %97, %cst_31 {dimension_numbers = #tpu.dot_dimension_numbers<[1], [0], [0], [1], [0, 0, 1, 1], [], []>} : vector<8x32xf32>, vector<32x32xf32>, vector<8x32xf32> -> vector<8x32xf32>
    %c0_32 = arith.constant 0 : index
    %c0_33 = arith.constant 0 : index
    %99 = vector.load %arg6[%c0_32, %c0_33] : memref<1x32xf32, #tpu.memory_space<vmem>>, vector<1x32xf32>
    %100 = vector.broadcast %99 : vector<1x32xf32> to vector<8x32xf32>
    %101 = arith.addf %98, %100 : vector<8x32xf32>
    %102 = arith.addf %0, %101 : vector<8x32xf32>
    %cst_34 = arith.constant 1.000000e+00 : f32
    %103 = vector.broadcast %cst_34 : f32 to vector<8x32xf32>
    %104 = arith.mulf %103, %102 : vector<8x32xf32>
    %c0_35 = arith.constant 0 : index
    %c0_36 = arith.constant 0 : index
    %105 = vector.load %arg7[%c0_35, %c0_36] : memref<1x32xf32, #tpu.memory_space<vmem>>, vector<1x32xf32>
    %c0_37 = arith.constant 0 : index
    %c0_38 = arith.constant 0 : index
    %106 = vector.load %arg8[%c0_37, %c0_38] : memref<1x32xf32, #tpu.memory_space<vmem>>, vector<1x32xf32>
    %cst_39 = arith.constant dense<0.000000e+00> : vector<8xf32>
    %107 = vector.multi_reduction <add>, %104, %cst_39 [1] : vector<8x32xf32> to vector<8xf32>
    %108 = vector.shape_cast %107 : vector<8xf32> to vector<8x1xf32>
    %cst_40 = arith.constant 3.200000e+01 : f32
    %109 = vector.broadcast %cst_40 : f32 to vector<8x1xf32>
    %110 = arith.divf %108, %109 : vector<8x1xf32>
    %111 = vector.broadcast %110 : vector<8x1xf32> to vector<8x32xf32>
    %112 = arith.subf %104, %111 : vector<8x32xf32>
    %113 = arith.mulf %112, %112 : vector<8x32xf32>
    %cst_41 = arith.constant dense<0.000000e+00> : vector<8xf32>
    %114 = vector.multi_reduction <add>, %113, %cst_41 [1] : vector<8x32xf32> to vector<8xf32>
    %115 = vector.shape_cast %114 : vector<8xf32> to vector<8x1xf32>
    %cst_42 = arith.constant 3.200000e+01 : f32
    %116 = vector.broadcast %cst_42 : f32 to vector<8x1xf32>
    %117 = arith.divf %115, %116 : vector<8x1xf32>
    %118 = vector.broadcast %110 : vector<8x1xf32> to vector<8x32xf32>
    %119 = arith.subf %104, %118 : vector<8x32xf32>
    %cst_43 = arith.constant 9.99999974E-6 : f32
    %120 = vector.broadcast %cst_43 : f32 to vector<8x1xf32>
    %121 = arith.addf %117, %120 : vector<8x1xf32>
    %122 = math.rsqrt %121 : vector<8x1xf32>
    %123 = vector.broadcast %122 : vector<8x1xf32> to vector<8x32xf32>
    %124 = arith.mulf %119, %123 : vector<8x32xf32>
    %125 = vector.broadcast %105 : vector<1x32xf32> to vector<8x32xf32>
    %126 = arith.mulf %124, %125 : vector<8x32xf32>
    %127 = vector.broadcast %106 : vector<1x32xf32> to vector<8x32xf32>
    %128 = arith.addf %126, %127 : vector<8x32xf32>
    %c0_44 = arith.constant 0 : index
    %c0_45 = arith.constant 0 : index
    %129 = vector.load %arg9[%c0_44, %c0_45] : memref<32x128xf32, #tpu.memory_space<vmem>>, vector<32x128xf32>
    %cst_46 = arith.constant dense<0.000000e+00> : vector<8x128xf32>
    %130 = tpu.matmul %128, %129, %cst_46 {dimension_numbers = #tpu.dot_dimension_numbers<[1], [0], [0], [1], [0, 0, 1, 1], [], []>} : vector<8x32xf32>, vector<32x128xf32>, vector<8x128xf32> -> vector<8x128xf32>
    %c0_47 = arith.constant 0 : index
    %c0_48 = arith.constant 0 : index
    %131 = vector.load %arg10[%c0_47, %c0_48] : memref<1x128xf32, #tpu.memory_space<vmem>>, vector<1x128xf32>
    %132 = vector.broadcast %131 : vector<1x128xf32> to vector<8x128xf32>
    %133 = arith.addf %130, %132 : vector<8x128xf32>
    %cst_49 = arith.constant 5.000000e-01 : f32
    %134 = vector.broadcast %cst_49 : f32 to vector<8x128xf32>
    %135 = arith.mulf %133, %134 : vector<8x128xf32>
    %cst_50 = arith.constant 1.41421354 : f32
    %136 = vector.broadcast %cst_50 : f32 to vector<8x128xf32>
    %137 = arith.divf %133, %136 : vector<8x128xf32>
    %138 = math.erf %137 : vector<8x128xf32>
    %cst_51 = arith.constant 1.000000e+00 : f32
    %139 = vector.broadcast %cst_51 : f32 to vector<8x128xf32>
    %140 = arith.addf %139, %138 : vector<8x128xf32>
    %141 = arith.mulf %135, %140 : vector<8x128xf32>
    %c0_52 = arith.constant 0 : index
    %c0_53 = arith.constant 0 : index
    %142 = vector.load %arg11[%c0_52, %c0_53] : memref<128x32xf32, #tpu.memory_space<vmem>>, vector<128x32xf32>
    %cst_54 = arith.constant dense<0.000000e+00> : vector<8x32xf32>
    %143 = tpu.matmul %141, %142, %cst_54 {dimension_numbers = #tpu.dot_dimension_numbers<[1], [0], [0], [1], [0, 0, 1, 1], [], []>} : vector<8x128xf32>, vector<128x32xf32>, vector<8x32xf32> -> vector<8x32xf32>
    %c0_55 = arith.constant 0 : index
    %c0_56 = arith.constant 0 : index
    %144 = vector.load %arg12[%c0_55, %c0_56] : memref<1x32xf32, #tpu.memory_space<vmem>>, vector<1x32xf32>
    %145 = vector.broadcast %144 : vector<1x32xf32> to vector<8x32xf32>
    %146 = arith.addf %143, %145 : vector<8x32xf32>
    %147 = arith.addf %104, %146 : vector<8x32xf32>
    %cst_57 = arith.constant 1.000000e+00 : f32
    %148 = vector.broadcast %cst_57 : f32 to vector<8x32xf32>
    %149 = arith.mulf %148, %147 : vector<8x32xf32>
    %c0_58 = arith.constant 0 : index
    %c0_59 = arith.constant 0 : index
    %150 = vector.load %arg13[%c0_58, %c0_59] : memref<8x32xf32, #tpu.memory_space<vmem>>, vector<8x32xf32>
    tpu.vector_store %arg13[%c0_58, %c0_59], %149 {strides = array<i32>} : memref<8x32xf32, #tpu.memory_space<vmem>>, vector<8x32xf32>,
    return
  }
  func.func @transform_0(%arg0: i32) -> (i32, i32) {
    %c0_i32 = arith.constant 0 : i32
    %c0_i32_0 = arith.constant 0 : i32
    return %arg0, %c0_i32 : i32, i32
  }
  func.func @transform_1(%arg0: i32) -> (i32, i32) {
    %c0_i32 = arith.constant 0 : i32
    %c0_i32_0 = arith.constant 0 : i32
    %c0_i32_1 = arith.constant 0 : i32
    return %c0_i32, %c0_i32_0 : i32, i32
  }
  func.func @transform_2(%arg0: i32) -> (i32, i32) {
    %c0_i32 = arith.constant 0 : i32
    %c0_i32_0 = arith.constant 0 : i32
    %c0_i32_1 = arith.constant 0 : i32
    return %c0_i32, %c0_i32_0 : i32, i32
  }
  func.func @transform_3(%arg0: i32) -> (i32, i32) {
    %c0_i32 = arith.constant 0 : i32
    %c0_i32_0 = arith.constant 0 : i32
    %c0_i32_1 = arith.constant 0 : i32
    return %c0_i32, %c0_i32_0 : i32, i32
  }
  func.func @transform_4(%arg0: i32) -> (i32, i32) {
    %c0_i32 = arith.constant 0 : i32
    %c0_i32_0 = arith.constant 0 : i32
    %c0_i32_1 = arith.constant 0 : i32
    return %c0_i32, %c0_i32_0 : i32, i32
  }
  func.func @transform_5(%arg0: i32) -> (i32, i32) {
    %c0_i32 = arith.constant 0 : i32
    %c0_i32_0 = arith.constant 0 : i32
    %c0_i32_1 = arith.constant 0 : i32
    return %c0_i32, %c0_i32_0 : i32, i32
  }
  func.func @transform_6(%arg0: i32) -> (i32, i32) {
    %c0_i32 = arith.constant 0 : i32
    %c0_i32_0 = arith.constant 0 : i32
    %c0_i32_1 = arith.constant 0 : i32
    return %c0_i32, %c0_i32_0 : i32, i32
  }
  func.func @transform_7(%arg0: i32) -> (i32, i32) {
    %c0_i32 = arith.constant 0 : i32
    %c0_i32_0 = arith.constant 0 : i32
    %c0_i32_1 = arith.constant 0 : i32
    return %c0_i32, %c0_i32_0 : i32, i32
  }
  func.func @transform_8(%arg0: i32) -> (i32, i32) {
    %c0_i32 = arith.constant 0 : i32
    %c0_i32_0 = arith.constant 0 : i32
    %c0_i32_1 = arith.constant 0 : i32
    return %c0_i32, %c0_i32_0 : i32, i32
  }
  func.func @transform_9(%arg0: i32) -> (i32, i32) {
    %c0_i32 = arith.constant 0 : i32
    %c0_i32_0 = arith.constant 0 : i32
    %c0_i32_1 = arith.constant 0 : i32
    return %c0_i32, %c0_i32_0 : i32, i32
  }
  func.func @transform_10(%arg0: i32) -> (i32, i32) {
    %c0_i32 = arith.constant 0 : i32
    %c0_i32_0 = arith.constant 0 : i32
    %c0_i32_1 = arith.constant 0 : i32
    return %c0_i32, %c0_i32_0 : i32, i32
  }
  func.func @transform_11(%arg0: i32) -> (i32, i32) {
    %c0_i32 = arith.constant 0 : i32
    %c0_i32_0 = arith.constant 0 : i32
    %c0_i32_1 = arith.constant 0 : i32
    return %c0_i32, %c0_i32_0 : i32, i32
  }
  func.func @transform_12(%arg0: i32) -> (i32, i32) {
    %c0_i32 = arith.constant 0 : i32
    %c0_i32_0 = arith.constant 0 : i32
    return %arg0, %c0_i32 : i32, i32
  }
}

</mosaic_0001>

<bundles_post_ra>
// kernel: tpu_custom_call.1
= control target key start
LH: loop header
LB: loop body
LE: loop exit
PB: predicated region body
PF: predicated region fallthrough
CT: control target
= control target key end

     0   :  { %s3360_s0 = inlined_call_operand.hbm [shape: f32[16,32], index: 0, kind: input, shape index: {}]   ;;  %s3361_s1 = inlined_call_operand.hbm [shape: f32[1,32], index: 1, kind: input, shape index: {}]   ;;  %s3362_s2 = inlined_call_operand.hbm [shape: f32[1,32], index: 2, kind: input, shape index: {}]   ;;  %s3363_s3 = inlined_call_operand.hbm [shape: f32[32,96], index: 3, kind: input, shape index: {}]   ;;  %s3364_s4 = inlined_call_operand.hbm [shape: f32[32,32], index: 4, kind: input, shape index: {}]   ;;  %s3365_s5 = inlined_call_operand.hbm [shape: f32[1,32], index: 5, kind: input, shape index: {}]   ;;  %s3366_s6 = inlined_call_operand.hbm [shape: f32[1,32], index: 6, kind: input, shape index: {}]   ;;  %s3367_s7 = inlined_call_operand.hbm [shape: f32[1,32], index: 7, kind: input, shape index: {}]   ;;  %s3368_s8 = inlined_call_operand.hbm [shape: f32[32,128], index: 8, kind: input, shape index: {}]   ;;  %s3369_s9 = inlined_call_operand.hbm [shape: f32[1,128], index: 9, kind: input, shape index: {}]   ;;  %s3370_s10 = inlined_call_operand.hbm [shape: f32[128,32], index: 10, kind: input, shape index: {}]   ;;  %s3371_s11 = inlined_call_operand.hbm [shape: f32[1,32], index: 11, kind: input, shape index: {}]   ;;  %s3372_s12 = inlined_call_operand.hbm [shape: f32[16,32], index: 12, kind: output, shape index: {}]  }
   0x1   :  { %3382 = sst [smem:[#allocation32_spill]] %s3361_s1 }
   0x2   :  { %3383 = sst [smem:[#allocation33_spill]] %s3362_s2 }
   0x3   :  { %3384 = sst [smem:[#allocation34_spill]] %s3363_s3 }
   0x4   :  { %3385 = sst [smem:[#allocation35_spill]] %s3372_s12 }
   0x5   :  { %17 = vsyncpa [#allocation3], 0 }
   0x6   :  { %19 = vsyncpa [#allocation3 + $0x1], 0 }
   0x7   :  { %20 = vsyncpa [#allocation6], 0 }
   0x8   :  { %21 = vsyncpa [#allocation9], 0 }
   0x9   :  { %22 = vsyncpa [#allocation12], 0 }
   0xa   :  { %23 = vsyncpa [#allocation15], 0 }
   0xb   :  { %24 = vsyncpa [#allocation18], 0 }
   0xc   :  { %25 = vsyncpa [#allocation21], 0 }
   0xd   :  { %26 = vsyncpa [#allocation4], 0 }
   0xe   :  { %28 = vsyncpa [#allocation4 + $0x1], 0  ;;  %s2830_s21 = smov 0   ;;  %s2832_s22 = smov 0  }
   0xf   :  { %s2834_s23 = smov 0   ;;  %s2836_s24 = smov 0  }
  0x10 LB: > { %s2733_s25 = smov [#allocation5]   ;;  %s2851_s27 = sadd.s32 4294967295, %s2731_s24   ;;  %s2731_s24 = sphi %s2836_s24, %s3421_s24   ;;  %s2727_s23 = sphi %s2834_s23, %s3420_s23   ;;  %s2723_s22 = sphi %s2832_s22, %s3419_s22   ;;  %s2719_s21 = sphi %s2830_s21, %s3418_s21  }
  0x11   : > { %s335_s26 = sshll.u32 %s2733_s25, 4  ;;  %p1852_p0 = scmp.ge.s32.totalorder %s2731_s24, 1  ;;  %s2856_s26 = int_to_ptr.vmem [resolvable:$true] %s335_s26 }
  0x12   : > { %p3379_p1 = scmp.eq.s32.totalorder %s2851_s27, 0  ;;  %p322_p2 = scmp.lt.s32.totalorder %s2731_s24, 3 }
  0x13   : > { %s2734_s29 = smov [#allocation8]   ;;  %s2735_s14 = smov [#allocation11]  }
  0x14   : > { %p2858_p3 = pnand %p1852_p0, %p322_p2  ;;  %s356_s30 = sshll.u32 %s2734_s29, 4  ;;  %s2865_s30 = int_to_ptr.vmem [resolvable:$true] %s356_s30 }
  0x15   : > { %s383_s15 = sshll.u32 %s2735_s14, 4  ;;  %s3389_s1 = sld [smem:[#allocation32_spill]]  ;;  %s2873_s15 = int_to_ptr.vmem [resolvable:$true] %s383_s15 }
  0x16   : > { %s3386_s28 = scalar_select %p2858_p3, 1, 0 }
  0x17   : > { %p2153_p5 = pneg %p2858_p3 }
  0x18   : > { %3387 = sst [smem:[#allocation31_spill]] %s3386_s28 }
  0x19   : > { %p2869_p6 = pnand %p2153_p5, %p3379_p1 }
  0x1b   : > { %s2303_s18 = scalar_lea.hbm %s3389_s1, 16  ;;  %p2883_p8 = pneg %p2869_p6 }
  0x1c   : > { %p2304_p7 = scmp.ne.s32.totalorder %s3389_s1, %s2303_s18  ;;  %p2310_p11 = scmp.lt.u32.totalorder %s2303_s18, %s3389_s1 }
  0x1e   : > { %p2306_p9 = pnand %p2883_p8, %p2304_p7 }
  0x20   : > { %p2307_p10 = pneg %p2306_p9 }
  0x22   : > { %p2312_p12 = pnand %p2310_p11, %p2307_p10 }
  0x24   : > { %2315 = shalt.err (!%p2312_p12)
}
  0x25   : > { %s2316_s16 = scalar_lea.vmem %s2856_s26, 16  ;;  %s2323_s17 = scalar_lea.vmem %s2856_s26, 32 }
  0x26   : > { %p2317_p13 = scmp.ne.s32.totalorder %s2856_s26, %s2316_s16  ;;  %p2324_p5 = scmp.lt.s32.totalorder %s2856_s26, %s2856_s26 }
  0x27   : > { %p2325_p7 = scmp.lt.s32.totalorder %s2323_s17, %s2316_s16 }
  0x28   : > { %p2319_p0 = pnand %p2317_p13, %p2883_p8 }
  0x29   : > { %p2326_p9 = por %p2325_p7, %p2324_p5 }
  0x2a   : > { %p2320_p2 = pneg %p2319_p0 }
  0x2c   : > { %p2327_p4 = pnand %p2326_p9, %p2320_p2 }
  0x2e   : > { %2330 = shalt.err (!%p2327_p4)
}
  0x2f   : > { %2156 = dma.hbm_to_vmem [thread:$0]  (!%p2869_p6), %s3389_s1, 16, %s2856_s26, [#allocation6]  }
  0x30   : > { %s3391_s3 = sld [smem:[#allocation34_spill]] }
  0x36   : > { %s2331_s14 = scalar_lea.hbm %s3391_s3, 512 }
  0x37   : > { %p2332_p10 = scmp.ne.s32.totalorder %s3391_s3, %s2331_s14  ;;  %p2338_p4 = scmp.lt.u32.totalorder %s2331_s14, %s3391_s3 }
  0x39   : > { %p2334_p11 = pnand %p2332_p10, %p2883_p8 }
  0x3b   : > { %p2335_p12 = pneg %p2334_p11 }
  0x3d   : > { %p2340_p13 = pnand %p2338_p4, %p2335_p12 }
  0x3f   : > { %2343 = shalt.err (!%p2340_p13)
}
  0x40   : > { %s2344_s26 = scalar_lea.vmem %s2865_s30, 512  ;;  %p2352_p7 = scmp.lt.s32.totalorder %s2865_s30, %s2865_s30 }
  0x41   : > { %p2345_p0 = scmp.ne.s32.totalorder %s2865_s30, %s2344_s26  ;;  %p2353_p9 = scmp.lt.s32.totalorder %s2344_s26, %s2344_s26 }
  0x43   : > { %p2347_p2 = pnand %p2345_p0, %p2883_p8  ;;  %p2354_p10 = por %p2353_p9, %p2352_p7 }
  0x45   : > { %p2348_p5 = pneg %p2347_p2 }
  0x47   : > { %p2355_p11 = pnand %p2354_p10, %p2348_p5 }
  0x49   : > { %2358 = shalt.err (!%p2355_p11)
}
  0x4a   : > { %s3375_s12 = smov 128   ;;  %s3377_s28 = smov 8  }
  0x4b   : > { %2162 = dma.hbm_to_vmem [thread:$0]  (!%p2869_p6), %s3391_s3, 512, %s2865_s30, [#allocation9], %s3375_s12, %s3375_s12, %s3377_s28  }
  0x4c   : > { %s2359_s14 = scalar_lea.hbm %s3365_s5, 16 }
  0x4d   : > { %p2360_p12 = scmp.ne.s32.totalorder %s3365_s5, %s2359_s14  ;;  %p2366_p0 = scmp.lt.u32.totalorder %s2359_s14, %s3365_s5 }
  0x4f   : > { %p2362_p4 = pnand %p2360_p12, %p2883_p8 }
  0x51   : > { %p2363_p13 = pneg %p2362_p4 }
  0x53   : > { %p2368_p2 = pnand %p2366_p0, %p2363_p13 }
  0x55   : > { %2371 = shalt.err (!%p2368_p2)
}
  0x56   : > { %s2372_s30 = scalar_lea.vmem %s2873_s15, 16  ;;  %s2379_s18 = scalar_lea.vmem %s2873_s15, 32 }
  0x57   : > { %p2373_p5 = scmp.ne.s32.totalorder %s2873_s15, %s2372_s30  ;;  %p2380_p10 = scmp.lt.s32.totalorder %s2873_s15, %s2873_s15 }
  0x58   : > { %p2381_p11 = scmp.lt.s32.totalorder %s2379_s18, %s2372_s30 }
  0x59   : > { %p2375_p7 = pnand %p2373_p5, %p2883_p8 }
  0x5a   : > { %p2382_p12 = por %p2381_p11, %p2380_p10 }
  0x5b   : > { %p2376_p9 = pneg %p2375_p7 }
  0x5d   : > { %p2383_p4 = pnand %p2382_p12, %p2376_p9 }
  0x5f   : > { %2386 = shalt.err (!%p2383_p4)
}
  0x60   : > { %2168 = dma.hbm_to_vmem [thread:$0]  (!%p2869_p6), %s3365_s5, 16, %s2873_s15, [#allocation12]  }
  0x61   : > { %s2738_s20 = smov [#allocation14]   ;;  %s2739_s14 = smov [#allocation17]  }
  0x62   : > { %s405_s29 = sshll.u32 %s2738_s20, 4  ;;  %s429_s16 = sshll.u32 %s2739_s14, 4  ;;  %s406_s29 = int_to_ptr.vmem [resolvable:$true] %s405_s29  ;;  %s430_s16 = int_to_ptr.vmem [resolvable:$true] %s429_s16 }
  0x63   : > { %s2387_s30 = scalar_lea.hbm %s3367_s7, 16 }
  0x64   : > { %p2388_p13 = scmp.ne.s32.totalorder %s3367_s7, %s2387_s30  ;;  %p2394_p5 = scmp.lt.u32.totalorder %s2387_s30, %s3367_s7 }
  0x66   : > { %p2390_p0 = pnand %p2388_p13, %p2883_p8 }
  0x68   : > { %p2391_p2 = pneg %p2390_p0 }
  0x6a   : > { %p2396_p7 = pnand %p2394_p5, %p2391_p2 }
  0x6c   : > { %2399 = shalt.err (!%p2396_p7)
}
  0x6d   : > { %s2400_s15 = scalar_lea.vmem %s406_s29, 16  ;;  %s2407_s19 = scalar_lea.vmem %s406_s29, 32 }
  0x6e   : > { %p2401_p9 = scmp.ne.s32.totalorder %s406_s29, %s2400_s15  ;;  %p2408_p12 = scmp.lt.s32.totalorder %s406_s29, %s406_s29 }
  0x6f   : > { %p2409_p4 = scmp.lt.s32.totalorder %s2407_s19, %s2400_s15 }
  0x70   : > { %p2403_p10 = pnand %p2401_p9, %p2883_p8 }
  0x71   : > { %p2410_p1 = por %p2409_p4, %p2408_p12 }
  0x72   : > { %p2404_p11 = pneg %p2403_p10 }
  0x74   : > { %p2411_p3 = pnand %p2410_p1, %p2404_p11 }
  0x76   : > { %2414 = shalt.err (!%p2411_p3)
}
  0x77   : > { %2174 = dma.hbm_to_vmem [thread:$0]  (!%p2869_p6), %s3367_s7, 16, %s406_s29, [#allocation15]  }
  0x78   : > { %s2415_s17 = scalar_lea.hbm %s3369_s9, 16 }
  0x79   : > { %p2416_p13 = scmp.ne.s32.totalorder %s3369_s9, %s2415_s17  ;;  %p2422_p3 = scmp.lt.u32.totalorder %s2415_s17, %s3369_s9 }
  0x7b   : > { %p2418_p0 = pnand %p2416_p13, %p2883_p8 }
  0x7d   : > { %p2419_p1 = pneg %p2418_p0 }
  0x7f   : > { %p2424_p2 = pnand %p2422_p3, %p2419_p1 }
  0x81   : > { %2427 = shalt.err (!%p2424_p2)
}
  0x82   : > { %s2428_s15 = scalar_lea.vmem %s430_s16, 16  ;;  %s2435_s29 = scalar_lea.vmem %s430_s16, 32 }
  0x83   : > { %p2429_p5 = scmp.ne.s32.totalorder %s430_s16, %s2428_s15  ;;  %p2436_p10 = scmp.lt.s32.totalorder %s430_s16, %s430_s16 }
  0x84   : > { %p2437_p11 = scmp.lt.s32.totalorder %s2435_s29, %s2428_s15 }
  0x85   : > { %p2431_p7 = pnand %p2429_p5, %p2883_p8 }
  0x86   : > { %p2438_p12 = por %p2437_p11, %p2436_p10 }
  0x87   : > { %p2432_p9 = pneg %p2431_p7 }
  0x89   : > { %p2439_p4 = pnand %p2438_p12, %p2432_p9 }
  0x8b   : > { %2442 = shalt.err (!%p2439_p4)
}
  0x8c   : > { %2180 = dma.hbm_to_vmem [thread:$0]  (!%p2869_p6), %s3369_s9, 16, %s430_s16, [#allocation18]  }
  0x8d   : > { %s2740_s20 = smov [#allocation7]   ;;  %s2741_s14 = smov [#allocation10]  }
  0x8e   : > { %s346_s28 = sshll.u32 %s2740_s20, 4  ;;  %s369_s17 = sshll.u32 %s2741_s14, 4  ;;  %s347_s28 = int_to_ptr.vmem [resolvable:$true] %s346_s28  ;;  %s370_s17 = int_to_ptr.vmem [resolvable:$true] %s369_s17 }
  0x8f   : > { %s3392_s2 = sld [smem:[#allocation33_spill]] }
  0x95   : > { %s2443_s18 = scalar_lea.hbm %s3392_s2, 16 }
  0x96   : > { %p2444_p13 = scmp.ne.s32.totalorder %s3392_s2, %s2443_s18  ;;  %p2450_p3 = scmp.lt.u32.totalorder %s2443_s18, %s3392_s2 }
  0x98   : > { %p2446_p0 = pnand %p2444_p13, %p2883_p8 }
  0x9a   : > { %p2447_p1 = pneg %p2446_p0 }
  0x9c   : > { %p2452_p2 = pnand %p2450_p3, %p2447_p1 }
  0x9e   : > { %2455 = shalt.err (!%p2452_p2)
}
  0x9f   : > { %s2456_s16 = scalar_lea.vmem %s347_s28, 16  ;;  %s2463_s12 = scalar_lea.vmem %s347_s28, 32 }
  0xa0   : > { %p2457_p5 = scmp.ne.s32.totalorder %s347_s28, %s2456_s16  ;;  %p2464_p10 = scmp.lt.s32.totalorder %s347_s28, %s347_s28 }
  0xa1   : > { %p2465_p11 = scmp.lt.s32.totalorder %s2463_s12, %s2456_s16 }
  0xa2   : > { %p2459_p7 = pnand %p2457_p5, %p2883_p8 }
  0xa3   : > { %p2466_p12 = por %p2465_p11, %p2464_p10 }
  0xa4   : > { %p2460_p9 = pneg %p2459_p7 }
  0xa6   : > { %p2467_p4 = pnand %p2466_p12, %p2460_p9 }
  0xa8   : > { %2470 = shalt.err (!%p2467_p4)
}
  0xa9   : > { %2159 = dma.hbm_to_vmem [thread:$0]  (!%p2869_p6), %s3392_s2, 16, %s347_s28, [#allocation6]  }
  0xaa   : > { %s2471_s18 = scalar_lea.hbm %s3364_s4, 512 }
  0xab   : > { %p2472_p13 = scmp.ne.s32.totalorder %s3364_s4, %s2471_s18  ;;  %p2478_p3 = scmp.lt.u32.totalorder %s2471_s18, %s3364_s4 }
  0xad   : > { %p2474_p0 = pnand %p2472_p13, %p2883_p8 }
  0xaf   : > { %p2475_p1 = pneg %p2474_p0 }
  0xb1   : > { %p2480_p2 = pnand %p2478_p3, %p2475_p1 }
  0xb3   : > { %2483 = shalt.err (!%p2480_p2)
}
  0xb4   : > { %s2484_s16 = scalar_lea.vmem %s370_s17, 512  ;;  %p2492_p10 = scmp.lt.s32.totalorder %s370_s17, %s370_s17 }
  0xb5   : > { %p2485_p5 = scmp.ne.s32.totalorder %s370_s17, %s2484_s16  ;;  %p2493_p11 = scmp.lt.s32.totalorder %s2484_s16, %s2484_s16 }
  0xb7   : > { %p2487_p7 = pnand %p2485_p5, %p2883_p8  ;;  %p2494_p12 = por %p2493_p11, %p2492_p10 }
  0xb9   : > { %p2488_p9 = pneg %p2487_p7 }
  0xbb   : > { %p2495_p4 = pnand %p2494_p12, %p2488_p9 }
  0xbd   : > { %2498 = shalt.err (!%p2495_p4)
}
  0xbe   : > { %s3393_s28 = smov 8   ;;  %s3394_s12 = smov 128  }
  0xbf   : > { %2165 = dma.hbm_to_vmem [thread:$0]  (!%p2869_p6), %s3364_s4, 512, %s370_s17, [#allocation9], %s3394_s12, %s3394_s12, %s3393_s28  }
  0xc0   : > { %s2742_s26 = smov [#allocation13]   ;;  %s2743_s18 = smov [#allocation16]  }
  0xc1   : > { %s394_s30 = sshll.u32 %s2742_s26, 4  ;;  %s415_s1 = sshll.u32 %s2743_s18, 4  ;;  %s395_s30 = int_to_ptr.vmem [resolvable:$true] %s394_s30  ;;  %s416_s1 = int_to_ptr.vmem [resolvable:$true] %s415_s1 }
  0xc2   : > { %s2499_s19 = scalar_lea.hbm %s3366_s6, 16 }
  0xc3   : > { %p2500_p13 = scmp.ne.s32.totalorder %s3366_s6, %s2499_s19  ;;  %p2506_p3 = scmp.lt.u32.totalorder %s2499_s19, %s3366_s6 }
  0xc5   : > { %p2502_p0 = pnand %p2500_p13, %p2883_p8 }
  0xc7   : > { %p2503_p1 = pneg %p2502_p0 }
  0xc9   : > { %p2508_p2 = pnand %p2506_p3, %p2503_p1 }
  0xcb   : > { %2511 = shalt.err (!%p2508_p2)
}
  0xcc   : > { %s2512_s17 = scalar_lea.vmem %s395_s30, 16  ;;  %s2519_s14 = scalar_lea.vmem %s395_s30, 32 }
  0xcd   : > { %p2513_p5 = scmp.ne.s32.totalorder %s395_s30, %s2512_s17  ;;  %p2520_p10 = scmp.lt.s32.totalorder %s395_s30, %s395_s30 }
  0xce   : > { %p2521_p11 = scmp.lt.s32.totalorder %s2519_s14, %s2512_s17 }
  0xcf   : > { %p2515_p7 = pnand %p2513_p5, %p2883_p8 }
  0xd0   : > { %p2522_p12 = por %p2521_p11, %p2520_p10 }
  0xd1   : > { %p2516_p9 = pneg %p2515_p7 }
  0xd3   : > { %p2523_p4 = pnand %p2522_p12, %p2516_p9 }
  0xd5   : > { %2526 = shalt.err (!%p2523_p4)
}
  0xd6   : > { %2171 = dma.hbm_to_vmem [thread:$0]  (!%p2869_p6), %s3366_s6, 16, %s395_s30, [#allocation12]  }
  0xd7   : > { %s2527_s15 = scalar_lea.hbm %s3368_s8, 512 }
  0xd8   : > { %p2528_p13 = scmp.ne.s32.totalorder %s3368_s8, %s2527_s15  ;;  %p2534_p3 = scmp.lt.u32.totalorder %s2527_s15, %s3368_s8 }
  0xda   : > { %p2530_p0 = pnand %p2528_p13, %p2883_p8 }
  0xdc   : > { %p2531_p1 = pneg %p2530_p0 }
  0xde   : > { %p2536_p2 = pnand %p2534_p3, %p2531_p1 }
  0xe0   : > { %2539 = shalt.err (!%p2536_p2)
}
  0xe1   : > { %s2540_s17 = scalar_lea.vmem %s416_s1, 512  ;;  %p2548_p10 = scmp.lt.s32.totalorder %s416_s1, %s416_s1 }
  0xe2   : > { %p2541_p5 = scmp.ne.s32.totalorder %s416_s1, %s2540_s17  ;;  %p2549_p11 = scmp.lt.s32.totalorder %s2540_s17, %s2540_s17 }
  0xe4   : > { %p2543_p7 = pnand %p2541_p5, %p2883_p8  ;;  %p2550_p12 = por %p2549_p11, %p2548_p10 }
  0xe6   : > { %p2544_p9 = pneg %p2543_p7 }
  0xe8   : > { %p2551_p4 = pnand %p2550_p12, %p2544_p9 }
  0xea   : > { %2554 = shalt.err (!%p2551_p4)
}
  0xeb   : > { %2177 = dma.hbm_to_vmem [thread:$0]  (!%p2869_p6), %s3368_s8, 512, %s416_s1, [#allocation15], %s3394_s12, %s3394_s12, %s3393_s28  }
  0xec   : > { %s2744_s2 = smov [#allocation19]   ;;  %s2745_s3 = smov [#allocation20]  }
  0xed   : > { %s439_s26 = sshll.u32 %s2744_s2, 4  ;;  %s453_s18 = sshll.u32 %s2745_s3, 4  ;;  %s440_s26 = int_to_ptr.vmem [resolvable:$true] %s439_s26  ;;  %s454_s18 = int_to_ptr.vmem [resolvable:$true] %s453_s18 }
  0xee   : > { %s2555_s19 = scalar_lea.hbm %s3370_s10, 2048 }
  0xef   : > { %p2556_p13 = scmp.ne.s32.totalorder %s3370_s10, %s2555_s19  ;;  %p2562_p3 = scmp.lt.u32.totalorder %s2555_s19, %s3370_s10 }
  0xf1   : > { %p2558_p0 = pnand %p2556_p13, %p2883_p8 }
  0xf3   : > { %p2559_p1 = pneg %p2558_p0 }
  0xf5   : > { %p2564_p2 = pnand %p2562_p3, %p2559_p1 }
  0xf7   : > { %2567 = shalt.err (!%p2564_p2)
}
  0xf8   : > { %s2568_s1 = scalar_lea.vmem %s440_s26, 2048  ;;  %p2576_p10 = scmp.lt.s32.totalorder %s440_s26, %s440_s26 }
  0xf9   : > { %p2569_p5 = scmp.ne.s32.totalorder %s440_s26, %s2568_s1  ;;  %p2577_p11 = scmp.lt.s32.totalorder %s2568_s1, %s2568_s1 }
  0xfb   : > { %p2571_p7 = pnand %p2569_p5, %p2883_p8  ;;  %p2578_p12 = por %p2577_p11, %p2576_p10 }
  0xfd   : > { %p2572_p9 = pneg %p2571_p7 }
  0xff   : > { %p2579_p4 = pnand %p2578_p12, %p2572_p9 }
 0x101   : > { %2582 = shalt.err (!%p2579_p4)
}
 0x102   : > { %2183 = dma.hbm_to_vmem [thread:$0]  (!%p2869_p6), %s3370_s10, 2048, %s440_s26, [#allocation18], %s3394_s12, %s3394_s12, %s3393_s28  }
 0x103   : > { %s2583_s29 = scalar_lea.hbm %s3371_s11, 16 }
 0x104   : > { %p2584_p13 = scmp.ne.s32.totalorder %s3371_s11, %s2583_s29  ;;  %p2590_p3 = scmp.lt.u32.totalorder %s2583_s29, %s3371_s11 }
 0x106   : > { %p2586_p0 = pnand %p2584_p13, %p2883_p8 }
 0x108   : > { %p2587_p1 = pneg %p2586_p0 }
 0x10a   : > { %p2592_p2 = pnand %p2590_p3, %p2587_p1 }
 0x10c   : > { %2595 = shalt.err (!%p2592_p2)
}
 0x10d   : > { %s2596_s30 = scalar_lea.vmem %s454_s18, 16  ;;  %s2603_s28 = scalar_lea.vmem %s454_s18, 32 }
 0x10e   : > { %p2597_p5 = scmp.ne.s32.totalorder %s454_s18, %s2596_s30  ;;  %p2604_p10 = scmp.lt.s32.totalorder %s454_s18, %s454_s18 }
 0x10f   : > { %p2605_p11 = scmp.lt.s32.totalorder %s2603_s28, %s2596_s30 }
 0x110   : > { %p2599_p7 = pnand %p2597_p5, %p2883_p8 }
 0x111   : > { %p2606_p12 = por %p2605_p11, %p2604_p10 }
 0x112   : > { %p2600_p9 = pneg %p2599_p7 }
 0x114   : > { %p2607_p4 = pnand %p2606_p12, %p2600_p9 }
 0x116   : > { %2610 = shalt.err (!%p2607_p4)
}
 0x117   : > { %2186 = dma.hbm_to_vmem [thread:$0]  (!%p2869_p6), %s3371_s11, 16, %s454_s18, [#allocation21]  }
 0x118   : > { %s1851_s25 = sadd.s32 4294967294, %s2731_s24   ;;  %s3110_s13 = sadd.s32 1, %s2731_s24  }
 0x119   : > { %s41_s1 = sadd.s32 1, %s2727_s23  ;;  %s38_s14 = ssub.s32 %s2731_s24, %s3110_s13 }
 0x11a   : > { %p48_p8 = scmp.ne.s32.totalorder %s2727_s23, %s2723_s22  ;;  %p39_p13 = scmp.eq.s32.totalorder %s38_s14, 0 }
 0x11b   : > { %p49_p0 = scmp.eq.s32.totalorder %s2731_s24, 0  ;;  %p54_p1 = scmp.ne.s32.totalorder %s2723_s22, %s2719_s21 }
 0x11c   : > { %p309_p3 = scmp.eq.s32.totalorder %s2851_s27, 1  ;;  %p3395_p5 = scmp.eq.s32.totalorder %s2851_s27, 0 }
 0x11d   : > { %s3122_s2 = scalar_select %p39_p13, %s2727_s23, %s41_s1  }
 0x11e   : > { %p50_p2 = por %p49_p0, %p48_p8  ;;  %p3126_p7 = por %p3395_p5, %p54_p1 }
 0x11f   : > { %p3130_p6 = por %p309_p3, %p48_p8  ;;  %p315_p9 = scmp.eq.s32.totalorder %s1851_s25, 1 }
 0x120   : > { %p2206_p10 = scmp.lt.s32.totalorder %s2731_s24, 2  ;;  %s464_s15 = sand.u32 1, %s2727_s23  }
 0x121   : > { %s3397_s18 = scalar_select %p3130_p6, 1, 0 }
 0x122   : > { %p3136_p11 = por %p315_p9, %p54_p1  ;;  %s1865_s19 = sshll.u32 %s464_s15, 3 }
 0x123   : > { %s1866_s16 = sshll.u32 %s2731_s24, 7  ;;  %s468_s28 = scalar_lea.vmem [#allocation2], %s1865_s19 }
 0x124   : > { %s3398_s29 = scalar_select %p3136_p11, 1, 0 }
 0x125   : > { %s3144_s30 = scalar_lea.hbm %s3360_s0, %s1866_s16  ;;  %s475_s12 = sshll.u32 %s468_s28, 4  ;;  %s3150_s12 = int_to_ptr.vmem [resolvable:$true] %s475_s12 }
 0x126   : > { %p3146_p12 = pnand %p2206_p10, %p50_p2  ;;  %s465_s25 = scalar_lea.sflag [#allocation3], %s464_s15 }
 0x127   : > { %s2611_s1 = scalar_lea.hbm %s3144_s30, 128  ;;  %s2616_s16 = scalar_lea.hbm %s3360_s0, 256 }
 0x128   : > { %p2612_p4 = scmp.ne.s32.totalorder %s3144_s30, %s2611_s1  ;;  %p2613_p8 = pneg %p3146_p12 }
 0x129   : > { %p2617_p1 = scmp.lt.u32.totalorder %s3144_s30, %s3360_s0  ;;  %p2618_p3 = scmp.lt.u32.totalorder %s2616_s16, %s2611_s1 }
 0x12a   : > { %p2614_p13 = pnand %p2613_p8, %p2612_p4  ;;  %p2620_p5 = scmp.lt.u32.totalorder %s2611_s1, %s3144_s30 }
 0x12b   : > { %p2619_p2 = por %p2618_p3, %p2617_p1 }
 0x12c   : > { %p2615_p0 = pneg %p2614_p13 }
 0x12d   : > { %p2621_p9 = por %p2620_p5, %p2619_p2 }
 0x12f   : > { %p2622_p10 = pnand %p2621_p9, %p2615_p0 }
 0x131   : > { %2625 = shalt.err (!%p2622_p10)
}
 0x132   : > { %s2626_s15 = scalar_lea.vmem %s3150_s12, 128  ;;  %s2746_s28 = smov [#allocation2]  }
 0x133   : > { %p2627_p4 = scmp.ne.s32.totalorder %s3150_s12, %s2626_s15  ;;  %s2631_s14 = sshll.u32 %s2746_s28, 4  ;;  %s2632_s14 = int_to_ptr.vmem [resolvable:$false] %s2631_s14 }
 0x134   : > { %s2633_s19 = scalar_lea.vmem %s2632_s14, 256  ;;  %p2634_p6 = scmp.lt.s32.totalorder %s3150_s12, %s2632_s14 }
 0x135   : > { %p2629_p13 = pnand %p2627_p4, %p2613_p8  ;;  %p2635_p1 = scmp.lt.s32.totalorder %s2633_s19, %s2626_s15 }
 0x137   : > { %p2630_p11 = pneg %p2629_p13  ;;  %p2636_p3 = por %p2635_p1, %p2634_p6 }
 0x139   : > { %p2637_p2 = pnand %p2636_p3, %p2630_p11 }
 0x13b   : > { %2640 = shalt.err (!%p2637_p2)
}
 0x13c   : > { %2190 = dma.hbm_to_vmem [thread:$0]  (!%p3146_p12), %s3144_s30, 128, %s3150_s12, %s465_s25  }
 0x13d   : > { %s3400_s1 = sld [smem:[#allocation31_spill]] }
 0x143   : > { %p3401_p0 = scmp.ne.s32.totalorder %s3400_s1, 0 }
 0x144   : > { %s3180_s16 = sand.u32 (!%p3401_p0), 1, %s2723_s22  }
 0x145   : > { %484 = sbr.rel (%p3401_p0) target bundleno = 2856 (0xb28), region = 68  ;;  %s1868_s20 = sshll.u32 (!%p3401_p0), %s3180_s16, 3 }
 0x146   : > { %s487_s17 = scalar_lea.sflag (!%p3401_p0), [#allocation3], %s3180_s16  ;;  %s490_s15 = scalar_lea.vmem (!%p3401_p0), [#allocation2], %s1868_s20 }
 0x14c   : > { %2686 = dma.done.wait (%p3126_p7), %s487_s17, 128  }
 0x14d   : > { %2688 = vsyncadd (%p3126_p7), %s487_s17, 4294967168  ;;  %p3402_p6 = scmp.eq.s32.totalorder %s2851_s27, 0 }
 0x14f   : > { %2690 = dma.done.wait (%p3402_p6), [#allocation6], 32   ;;  %p3403_p11 = pmov %p3402_p6 }
 0x150   : > { %p3404_p12 = pmov %p3402_p6 }
 0x151   : > { %2692 = vsyncadd (%p3403_p11), [#allocation6], 4294967264 }
 0x152   : > { %2694 = dma.done.wait (%p3404_p12), [#allocation9], 1024   ;;  %p3405_p8 = pmov %p3402_p6 }
 0x153   : > { %p3406_p5 = pmov %p3402_p6 }
 0x154   : > { %2696 = vsyncadd (%p3405_p8), [#allocation9], 4294966272 }
 0x155   : > { %2698 = dma.done.wait (%p3406_p5), [#allocation12], 32   ;;  %p3407_p9 = pmov %p3406_p5 }
 0x156   : > { %p3408_p7 = pmov %p3406_p5 }
 0x157   : > { %2700 = vsyncadd (%p3407_p9), [#allocation12], 4294967264 }
 0x158   : > { %2702 = dma.done.wait (%p3408_p7), [#allocation15], 528   ;;  %p3409_p10 = pmov %p3406_p5 }
 0x159   : > { %p3410_p4 = pmov %p3406_p5 }
 0x15a   : > { %2704 = vsyncadd (%p3409_p10), [#allocation15], 4294966768 }
 0x15b   : > { %2706 = dma.done.wait (%p3410_p4), [#allocation18], 2064   ;;  %p3411_p13 = pmov %p3410_p4 }
 0x15c   : > { %p3412_p1 = pmov %p3410_p4 }
 0x15d   : > { %2708 = vsyncadd (%p3411_p13), [#allocation18], 4294965232 }
 0x15e   : > { %2710 = dma.done.wait (%p3412_p1), [#allocation21], 16   ;;  %p3413_p3 = pmov %p3412_p1 }
 0x15f   : > { %vm578_vm0 = vcmask 261120   ;;  %v3214_v0 = vld [vmem:[%s490_s15] sm:$0xff]  ;;  %v607_v7 = vld [vmem:[#allocation8] sm:$0xff]  ;;  %v2747_v10 = vmov 0.0|0.0   ;;  %vm2748_vm1 = vmmov 0   ;;  %v2749_v13 = vmov 0.0  }
 0x160   : > { %2712 = vsyncadd (%p3413_p3), [#allocation21], 4294967280  ;;  %v579_v1 = vsel %vm578_vm0, %v3214_v0, 0.0  ;;  %v608_v8 = vld [vmem:[#allocation8 + $0x8] sm:$0xff]  ;;  %v609_v9 = vld [vmem:[#allocation8 + $0x10] sm:$0xff]  ;;  %2063 = vmatprep.subr.bf16.mxu1 %v2747_v10  ;;  %1963 = vmatprep.mubr.msk.f32.mxu1 %vm2748_vm1, %v2749_v13  ;;  %s2750_s3 = smov 96  }
 0x161   : > { %580 = vadd.xlane.f32.xlu0 %v579_v1  ;;  %v2064_v11 = vpack.c.bf16 %v608_v8, %v607_v7  ;;  %v610_v12 = vld [vmem:[#allocation8 + $0x18] sm:$0xff]  ;;  %1976 = vmatprep.subr.mxu0 %v2749_v13  ;;  %s2751_s30 = smov 120   ;;  %s2752_s12 = smov 88   ;;  %vm688_vm2 = vcmask 64512   ;;  %vm1359_vm3 = vcmask 130048   ;;  %vm1361_vm4 = vcmask 195584  }
 0x162   : > { %1978 = vmatprep.mubr.msk.f32.mxu0 %vm2748_vm1, %v2749_v13  ;;  %v2067_v14 = vpack.c.bf16 %v610_v12, %v609_v9  ;;  %v1881_v19 = vld [vmem:[#allocation5] ss:$0 sm:$0xff]  ;;  %v1882_v21 = vld [vmem:[#allocation7] ss:$0 sm:$0xff]  ;;  %s2753_s26 = smov 80   ;;  %s2754_s25 = smov 72  }
 0x163   : > { %2065 = vmatpush3.bf16.msra.mxu1 %v2064_v11  ;;  %s2755_s28 = smov 112   ;;  %s2756_s14 = smov 104  }
 0x164   : > { %2066 = vmatprep.subr.bf16.mxu1 %v2747_v10  ;;  %s2757_s19 = smov 64   ;;  %s2758_s1 = smov 48  }
 0x165   : > { %s2759_s17 = smov 40   ;;  %s2760_s15 = smov 56  }
 0x166   : > { %p3415_p0 = scmp.ne.s32.totalorder %s3397_s18, 0 }
 0x167   : > { %2068 = vmatpush3.bf16.msra.mxu1 %v2067_v14 }
 0x168   : > { %1966 = vmatprep.subr.mxu1 %v2749_v13 }
 0x1ee   : > { %v581_v2 = vpop.xlane.xlu0 %580 }
 0x1ef   : > { %v583_v3 = vmul.f32 0.03125, %v581_v2 }
 0x1f1   : > { %v584_v4 = vsub.f32 %v3214_v0, %v583_v3 }
 0x1f3   : > { %v585_v5 = vmul.f32 %v584_v4, %v584_v4 }
 0x1f5   : > { %v586_v6 = vsel %vm578_vm0, %v585_v5, 0.0 }
 0x1f6   : > { %587 = vadd.xlane.f32.xlu0 %v586_v6 }
 0x283   : > { %v588_v15 = vpop.xlane.xlu0 %587 }
 0x284   : > { %v589_v16 = vmul.f32 0.03125, %v588_v15 }
 0x286   : > { %v590_v17 = vadd.f32 1e-05, %v589_v16 }
 0x288   : > { %2281 = vrsqrt.f32 %v590_v17 }
 0x292   : > { %v2282_v18 = vpop.eup %2281 }
 0x293   : > { %v592_v20 = vmul.f32 %v2282_v18, %v584_v4 }
 0x295   : > { %v599_v22 = vmul.f32 %v1881_v19, %v592_v20 }
 0x297   : > { %v606_v23 = vadd.f32 %v1882_v21, %v599_v22  ;;  %v1363_v21 = vld [vmem:[#allocation10] sm:$0xff]  ;;  %v1364_v22 = vld [vmem:[#allocation10 + $0x8] sm:$0xff] }
 0x299   : > { %1964 = vmatmul.mubr.msk.f32.vlgmr.msra.gmra.mrb[0].mxu1 %vm578_vm0, %v606_v23  ;;  %v2070_v23 = vpack.c.bf16 %v1364_v22, %v1363_v21  ;;  %v1579_v22 = vld [vmem:[#allocation19 + $0x60] sm:$0xff] }
 0x29a   : > { %1968 = vmatprep.mubr.msk.f32.mxu1 %vm2748_vm1, %v2749_v13 }
 0x36c   : > { %v3231_v24 = vpop.f32.mrb[0].mxu1 }
 0x36d   : > { %686 = vrot.lane.b32.xlu1 %v3231_v24, %s2750_s3  ;;  %v1965_v25 = vpop.f32.mrb[1].mxu1  ;;  %v684_v26 = vmul.f32 0.35355338, %v3231_v24  ;;  %s2761_s3 = smov 8  }
 0x36f   : > { %851 = vrot.lane.b32.xlu0 %v684_v26, %s2751_s30  ;;  %s2762_s30 = smov 16  }
 0x371   : > { %853 = vrot.lane.b32.xlu1 %v3231_v24, %s2752_s12  ;;  %s2763_s12 = smov 24  }
 0x375   : > { %1018 = vrot.lane.b32.xlu1 %v3231_v24, %s2753_s26  ;;  %s1904_s26 = sshll.u32 %s2851_s27, 7  ;;  %s1663_s27 = scalar_lea.sflag [#allocation4], %s3180_s16 }
 0x379   : > { %1183 = vrot.lane.b32.xlu1 %v3231_v24, %s2754_s25  ;;  %s574_s25 = scalar_lea.vmem [#allocation22], %s1868_s20  ;;  %s2764_s20 = smov [#allocation22]  }
 0x37d   : > { %1016 = vrot.lane.b32.xlu1 %v684_v26, %s2755_s28  ;;  %s1676_s28 = sshll.u32 %s574_s25, 4  ;;  %s3317_s28 = int_to_ptr.vmem [resolvable:$true] %s1676_s28 }
 0x381   : > { %1181 = vrot.lane.b32.xlu1 %v684_v26, %s2756_s14 }
 0x3df   : > { %v687_v27 = vpop.permute.xlu1 %686 }
 0x3e0   : > { %1967 = vmatpush3.xpose.msk.msra.mxu1 %vm688_vm2, %v687_v27  ;;  %v1366_v27 = vld [vmem:[#allocation10 + $0x18] sm:$0xff] }
 0x3e1   : > { %1971 = vmatprep.subr.mxu1 %v2749_v13  ;;  %v852_v29 = vpop.permute.xlu0 %851 }
 0x3e3   : > { %v854_v28 = vpop.permute.xlu1 %853  ;;  %1969 = vmatmul.mubr.msk.f32.vlgmr.msra.gmra.mrb[2].mxu1 %vm688_vm2, %v684_v26  ;;  %v1365_v26 = vld [vmem:[#allocation10 + $0x10] sm:$0xff] }
 0x3e4   : > { %1977 = vmatpush3.xpose.msk.msra.mxu0 %vm688_vm2, %v854_v28  ;;  %1973 = vmatprep.mubr.msk.f32.mxu1 %vm2748_vm1, %v2749_v13  ;;  %v2073_v28 = vpack.c.bf16 %v1366_v27, %v1365_v26  ;;  %v1582_v26 = vld [vmem:[#allocation19 + $0x78] sm:$0xff] }
 0x3e5   : > { %1986 = vmatprep.subr.mxu0 %v2749_v13 }
 0x3e7   : > { %v1019_v30 = vpop.permute.xlu1 %1018  ;;  %1979 = vmatmul.mubr.msk.f32.vlgmr.msra.gmra.mrb[0].mxu0 %vm688_vm2, %v852_v29 }
 0x3e8   : > { %1987 = vmatpush3.xpose.msk.msra.mxu0 %vm688_vm2, %v1019_v30  ;;  %1988 = vmatprep.mubr.msk.f32.mxu0 %vm2748_vm1, %v2749_v13 }
 0x3e9   : > { %1996 = vmatprep.subr.mxu0 %v2749_v13 }
 0x3eb   : > { %v1184_v31 = vpop.permute.xlu1 %1183 }
 0x3ef   : > { %v1017_v32 = vpop.permute.xlu1 %1016 }
 0x3f0   : > { %1989 = vmatmul.mubr.msk.f32.vlgmr.msra.gmra.mrb[2].mxu0 %vm688_vm2, %v1017_v32 }
 0x3f1   : > { %1997 = vmatpush3.xpose.msk.msra.mxu0 %vm688_vm2, %v1184_v31  ;;  %1998 = vmatprep.mubr.msk.f32.mxu0 %vm2748_vm1, %v2749_v13 }
 0x3f2   : > { %2081 = vmatprep.subr.bf16.mxu0 %v2747_v10 }
 0x3f3   : > { %v1182_v33 = vpop.permute.xlu1 %1181 }
 0x3f4   : > { %1999 = vmatmul.mubr.msk.f32.vlgmr.msra.gmra.mrb[4].mxu0 %vm688_vm2, %v1182_v33 }
 0x3f5   : > { %2060 = vmatprep.mubr.msk.f32.mxu0 %vm2748_vm1, %v2749_v13 }
 0x4b6   : > { %v760_v34 = vpop.f32.mrb[2].mxu1 }
 0x4b7   : > { %v1970_v35 = vpop.f32.mrb[3].mxu1  ;;  %v764_v36 = vsel %vm688_vm2, %v760_v34, -inf }
 0x4b8   : > { %765 = vmax.xlane.f32.xlu1 %v764_v36 }
 0x4ba   : > { %v925_v37 = vpop.f32.mrb[0].mxu0 }
 0x4bb   : > { %v1980_v38 = vpop.f32.mrb[1].mxu0  ;;  %v929_v39 = vsel %vm688_vm2, %v925_v37, -inf }
 0x4bc   : > { %930 = vmax.xlane.f32.xlu0 %v929_v39 }
 0x4c3   : > { %v1090_v40 = vpop.f32.mrb[2].mxu0 }
 0x4c4   : > { %v1990_v41 = vpop.f32.mrb[3].mxu0  ;;  %v1094_v42 = vsel %vm688_vm2, %v1090_v40, -inf }
 0x4c5   : > { %1095 = vmax.xlane.f32.xlu1 %v1094_v42  ;;  %v1896_v41 = vld [vmem:[#allocation11] ss:$0 sm:$0xff] }
 0x4c7   : > { %v1255_v43 = vpop.f32.mrb[4].mxu0 }
 0x4c8   : > { %v2000_v44 = vpop.f32.mrb[5].mxu0  ;;  %v1259_v45 = vsel %vm688_vm2, %v1255_v43, -inf }
 0x4c9   : > { %1260 = vmax.xlane.f32.xlu0 %v1259_v45 }
 0x4d6   : > { %775 = vrot.lane.b32.xlu1 %v3231_v24, %s2757_s19 }
 0x545   : > { %v766_v46 = vpop.xlane.xlu1 %765 }
 0x546   : > { %v767_v47 = vsub.f32 %v760_v34, %v766_v46 }
 0x548   : > { %v768_v48 = vmul.f32 1.442695, %v767_v47 }
 0x549   : > { %v931_v49 = vpop.xlane.xlu0 %930 }
 0x54a   : > { %2283 = vpow2.f32 %v768_v48  ;;  %v932_v50 = vsub.f32 %v925_v37, %v931_v49 }
 0x54c   : > { %v933_v51 = vmul.f32 1.442695, %v932_v50 }
 0x54e   : > { %2285 = vpow2.f32 %v933_v51 }
 0x552   : > { %v1096_v52 = vpop.xlane.xlu1 %1095 }
 0x553   : > { %v1097_v53 = vsub.f32 %v1090_v40, %v1096_v52  ;;  %v1478_v52 = vld [vmem:[#allocation16 + $0x8] sm:$0xff] }
 0x554   : > { %v2284_v54 = vpop.eup %2283 }
 0x555   : > { %v1098_v55 = vmul.f32 1.442695, %v1097_v53  ;;  %v770_v56 = vsel %vm688_vm2, %v2284_v54, 0.0 }
 0x556   : > { %v1261_v57 = vpop.xlane.xlu0 %1260  ;;  %771 = vadd.xlane.f32.xlu1 %v770_v56  ;;  %v776_v58 = vpop.permute.xlu1 %775  ;;  %v1567_v56 = vld [vmem:[#allocation19] sm:$0xff] }
 0x557   : > { %2287 = vpow2.f32 %v1098_v55  ;;  %v1262_v59 = vsub.f32 %v1255_v43, %v1261_v57  ;;  %1972 = vmatpush3.msra.mxu1 %v776_v58  ;;  %v1568_v57 = vld [vmem:[#allocation19 + $0x8] sm:$0xff]  ;;  %v1569_v58 = vld [vmem:[#allocation19 + $0x10] sm:$0xff] }
 0x558   : > { %v2286_v60 = vpop.eup %2285  ;;  %1981 = vmatprep.subr.mxu1 %v2749_v13 }
 0x559   : > { %v1263_v61 = vmul.f32 1.442695, %v1262_v59  ;;  %v935_v62 = vsel %vm688_vm2, %v2286_v60, 0.0  ;;  %v2082_v59 = vpack.c.bf16 %v1568_v57, %v1567_v56 }
 0x55a   : > { %936 = vadd.xlane.f32.xlu0 %v935_v62  ;;  %v1571_v62 = vld [vmem:[#allocation19 + $0x20] sm:$0xff] }
 0x55b   : > { %2289 = vpow2.f32 %v1263_v61  ;;  %2083 = vmatpush3.bf16.msra.mxu0 %v2082_v59 }
 0x55c   : > { %2084 = vmatprep.subr.bf16.mxu0 %v2747_v10 }
 0x561   : > { %v2288_v63 = vpop.eup %2287 }
 0x562   : > { %v1100_v1 = vsel %vm688_vm2, %v2288_v63, 0.0 }
 0x563   : > { %1101 = vadd.xlane.f32.xlu1 %v1100_v1 }
 0x565   : > { %v2290_v2 = vpop.eup %2289 }
 0x566   : > { %v1265_v3 = vsel %vm688_vm2, %v2290_v2, 0.0 }
 0x567   : > { %1266 = vadd.xlane.f32.xlu0 %v1265_v3 }
 0x574   : > { %1105 = vrot.lane.b32.xlu1 %v3231_v24, %s2758_s1  ;;  %s3414_s1 = sld [smem:[#allocation35_spill]] }
 0x578   : > { %1270 = vrot.lane.b32.xlu1 %v3231_v24, %s2759_s17 }
 0x57a   : > { %s3315_s17 = scalar_lea.hbm %s3414_s1, %s1904_s26 }
 0x57d   : > { %940 = vrot.lane.b32.xlu0 %v3231_v24, %s2760_s15  ;;  %s2641_s15 = scalar_lea.vmem %s3317_s28, 128 }
 0x57e   : > { %p2642_p2 = scmp.ne.s32.totalorder %s3317_s28, %s2641_s15 }
 0x580   : > { %p2643_p6 = pnand %p2642_p2, %p3415_p0 }
 0x582   : > { %p2644_p11 = pneg %p2643_p6 }
 0x5e3   : > { %v772_v4 = vpop.xlane.xlu1 %771 }
 0x5e4   : > { %2291 = vrcp.f32 %v772_v4 }
 0x5e7   : > { %v937_v5 = vpop.xlane.xlu0 %936 }
 0x5e8   : > { %2293 = vrcp.f32 %v937_v5 }
 0x5ee   : > { %v2292_v6 = vpop.eup %2291 }
 0x5ef   : > { %v774_v7 = vmul.f32 %v2292_v6, %v2284_v54  ;;  %v1480_v54 = vld [vmem:[#allocation16 + $0x18] sm:$0xff] }
 0x5f0   : > { %v1102_v8 = vpop.xlane.xlu1 %1101  ;;  %v1898_v6 = vld [vmem:[#allocation13] ss:$0 sm:$0xff] }
 0x5f1   : > { %2295 = vrcp.f32 %v1102_v8  ;;  %1974 = vmatmul.mubr.msk.f32.vlgmr.msra.gmra.mrb[4].mxu1 %vm688_vm2, %v774_v7  ;;  %v1899_v8 = vld [vmem:[#allocation14] ss:$0 sm:$0xff] }
 0x5f2   : > { %1983 = vmatprep.mubr.msk.f32.mxu1 %vm2748_vm1, %v2749_v13  ;;  %v2294_v11 = vpop.eup %2293 }
 0x5f3   : > { %v939_v12 = vmul.f32 %v2294_v11, %v2286_v60  ;;  %v1570_v60 = vld [vmem:[#allocation19 + $0x18] sm:$0xff] }
 0x5f4   : > { %v1267_v9 = vpop.xlane.xlu0 %1266  ;;  %v1106_v14 = vpop.permute.xlu1 %1105  ;;  %v2085_v61 = vpack.c.bf16 %v1570_v60, %v1569_v58 }
 0x5f5   : > { %2297 = vrcp.f32 %v1267_v9 }
 0x5f6   : > { %2086 = vmatpush3.bf16.msra.mxu0 %v2085_v61 }
 0x5f7   : > { %2087 = vmatprep.subr.bf16.mxu0 %v2747_v10 }
 0x5f8   : > { %v941_v15 = vpop.permute.xlu0 %940  ;;  %v1271_v18 = vpop.permute.xlu1 %1270 }
 0x5f9   : > { %1982 = vmatpush3.msra.mxu1 %v941_v15 }
 0x5fa   : > { %1984 = vmatmul.mubr.msk.f32.vlgmr.msra.gmra.mrb[6].mxu1 %vm688_vm2, %v939_v12  ;;  %1991 = vmatprep.subr.mxu1 %v2749_v13  ;;  %v1573_v12 = vld [vmem:[#allocation19 + $0x30] sm:$0xff] }
 0x5fb   : > { %v2296_v16 = vpop.eup %2295  ;;  %1992 = vmatpush3.msra.mxu1 %v1106_v14  ;;  %1993 = vmatprep.mubr.msk.f32.mxu1 %vm2748_vm1, %v2749_v13  ;;  %v1574_v14 = vld [vmem:[#allocation19 + $0x38] sm:$0xff] }
 0x5fc   : > { %v1104_v17 = vmul.f32 %v2296_v16, %v2288_v63  ;;  %2001 = vmatprep.subr.mxu1 %v2749_v13  ;;  %v1572_v63 = vld [vmem:[#allocation19 + $0x28] sm:$0xff]  ;;  %v2091_v15 = vpack.c.bf16 %v1574_v14, %v1573_v12  ;;  %v1575_v16 = vld [vmem:[#allocation19 + $0x40] sm:$0xff] }
 0x5fd   : > { %v2088_v1 = vpack.c.bf16 %v1572_v63, %v1571_v62 }
 0x5fe   : > { %1994 = vmatmul.mubr.msk.f32.vlgmr.msra.gmra.mrb[8].mxu1 %vm688_vm2, %v1104_v17  ;;  %v1576_v17 = vld [vmem:[#allocation19 + $0x48] sm:$0xff] }
 0x5ff   : > { %v2298_v19 = vpop.eup %2297  ;;  %2002 = vmatpush3.msra.mxu1 %v1271_v18  ;;  %2003 = vmatprep.mubr.msk.f32.mxu1 %vm2748_vm1, %v2749_v13  ;;  %v2094_v18 = vpack.c.bf16 %v1576_v17, %v1575_v16 }
 0x600   : > { %v1269_v20 = vmul.f32 %v2298_v19, %v2290_v2  ;;  %2069 = vmatprep.subr.bf16.mxu1 %v2747_v10  ;;  %2089 = vmatpush3.bf16.msra.mxu0 %v2088_v1  ;;  %v1577_v19 = vld [vmem:[#allocation19 + $0x50] sm:$0xff] }
 0x601   : > { %2090 = vmatprep.subr.bf16.mxu0 %v2747_v10 }
 0x602   : > { %2004 = vmatmul.mubr.msk.f32.vlgmr.msra.gmra.mrb[10].mxu1 %vm688_vm2, %v1269_v20  ;;  %v1578_v20 = vld [vmem:[#allocation19 + $0x58] sm:$0xff] }
 0x603   : > { %2014 = vmatprep.mubr.msk.f32.mxu1 %vm2748_vm1, %v2749_v13  ;;  %2071 = vmatpush3.bf16.msra.mxu1 %v2070_v23  ;;  %v2097_v21 = vpack.c.bf16 %v1578_v20, %v1577_v19  ;;  %v1580_v23 = vld [vmem:[#allocation19 + $0x68] sm:$0xff] }
 0x604   : > { %2072 = vmatprep.subr.bf16.mxu1 %v2747_v10  ;;  %2092 = vmatpush3.bf16.msra.mxu0 %v2091_v15 }
 0x605   : > { %2093 = vmatprep.subr.bf16.mxu0 %v2747_v10 }
 0x607   : > { %2074 = vmatpush3.bf16.msra.mxu1 %v2073_v28  ;;  %v1900_v28 = vld [vmem:[#allocation17] ss:$0 sm:$0xff] }
 0x608   : > { %2075 = vmatprep.subr.bf16.mxu1 %v2747_v10  ;;  %2095 = vmatpush3.bf16.msra.mxu0 %v2094_v18 }
 0x609   : > { %2096 = vmatprep.subr.bf16.mxu0 %v2747_v10 }
 0x60c   : > { %2098 = vmatpush3.bf16.msra.mxu0 %v2097_v21 }
 0x60d   : > { %2099 = vmatprep.subr.bf16.mxu0 %v2747_v10 }
 0x6c4   : > { %v847_v24 = vpop.f32.mrb[4].mxu1 }
 0x6c5   : > { %v1975_v25 = vpop.f32.mrb[5].mxu1 }
 0x6c6   : > { %v1581_v25 = vld [vmem:[#allocation19 + $0x70] sm:$0xff] }
 0x6c7   : > { %v2103_v27 = vpack.c.bf16 %v1582_v26, %v1581_v25 }
 0x6cd   : > { %v1012_v29 = vpop.f32.mrb[6].mxu1 }
 0x6ce   : > { %1347 = vrot.lane.b32.xlu0 %v1012_v29, %s2761_s3  ;;  %v1985_v30 = vpop.f32.mrb[7].mxu1  ;;  %s2645_s3 = sshll.u32 %s2764_s20, 4  ;;  %s2646_s3 = int_to_ptr.vmem [resolvable:$false] %s2645_s3 }
 0x6cf   : > { %p2648_p12 = scmp.lt.s32.totalorder %s3317_s28, %s2646_s3 }
 0x6d1   : > { %v1177_v31 = vpop.f32.mrb[8].mxu1 }
 0x6d2   : > { %1351 = vrot.lane.b32.xlu1 %v1177_v31, %s2762_s30  ;;  %v1995_v32 = vpop.f32.mrb[9].mxu1  ;;  %s2647_s30 = scalar_lea.vmem %s2646_s3, 256 }
 0x6d3   : > { %p2649_p8 = scmp.lt.s32.totalorder %s2647_s30, %s2641_s15 }
 0x6d5   : > { %v1342_v33 = vpop.f32.mrb[10].mxu1  ;;  %p2650_p5 = por %p2649_p8, %p2648_p12 }
 0x6d6   : > { %1355 = vrot.lane.b32.xlu0 %v1342_v33, %s2763_s12  ;;  %v2005_v34 = vpop.f32.mrb[11].mxu1 }
 0x6d7   : > { %p2651_p9 = pnand %p2650_p5, %p2644_p11 }
 0x740   : > { %v1348_v35 = vpop.permute.xlu0 %1347 }
 0x741   : > { %v1358_v37 = vsel %vm688_vm2, %v847_v24, %v1348_v35  ;;  %v2100_v24 = vpack.c.bf16 %v1580_v23, %v1579_v22 }
 0x743   : > { %2101 = vmatpush3.bf16.msra.mxu0 %v2100_v24 }
 0x744   : > { %v1352_v36 = vpop.permute.xlu1 %1351  ;;  %2102 = vmatprep.subr.bf16.mxu0 %v2747_v10 }
 0x745   : > { %v1360_v38 = vsel %vm1359_vm3, %v1358_v37, %v1352_v36 }
 0x747   : > { %2104 = vmatpush3.bf16.msra.mxu0 %v2103_v27 }
 0x748   : > { %v1356_v39 = vpop.permute.xlu0 %1355 }
 0x749   : > { %v1362_v40 = vsel %vm1361_vm4, %v1360_v38, %v1356_v39 }
 0x74a   : > { %2015 = vmatmul.mubr.msk.f32.vlgmr.msra.gmra.mrb[12].mxu1 %vm578_vm0, %v1362_v40 }
 0x74b   : > { %2025 = vmatprep.mubr.msk.f32.mxu1 %vm2748_vm1, %v2749_v13  ;;  %v1477_v13 = vld [vmem:[#allocation16] sm:$0xff] }
 0x74c   : > { %v2076_v53 = vpack.c.bf16 %v1478_v52, %v1477_v13 }
 0x74e   : > { %2077 = vmatpush3.bf16.msra.mxu1 %v2076_v53 }
 0x74f   : > { %2078 = vmatprep.subr.bf16.mxu1 %v2747_v10  ;;  %v1902_v10 = vld [vmem:[#allocation20] ss:$0 sm:$0xff] }
 0x81d   : > { %v1443_v42 = vpop.f32.mrb[12].mxu1 }
 0x81e   : > { %v1444_v43 = vadd.f32 %v1896_v41, %v1443_v42  ;;  %v2016_v44 = vpop.f32.mrb[13].mxu1 }
 0x820   : > { %v3293_v45 = vadd.f32 %v1444_v43, %v3214_v0  ;;  %v1479_v0 = vld [vmem:[#allocation16 + $0x10] sm:$0xff] }
 0x821   : > { %v2079_v55 = vpack.c.bf16 %v1480_v54, %v1479_v0 }
 0x822   : > { %v1450_v46 = vsel %vm578_vm0, %v3293_v45, 0.0 }
 0x823   : > { %1451 = vadd.xlane.f32.xlu1 %v1450_v46  ;;  %2080 = vmatpush3.bf16.msra.mxu1 %v2079_v55 }
 0x8b0   : > { %v1452_v47 = vpop.xlane.xlu1 %1451 }
 0x8b1   : > { %v1453_v48 = vmul.f32 0.03125, %v1452_v47 }
 0x8b3   : > { %v1454_v49 = vsub.f32 %v3293_v45, %v1453_v48 }
 0x8b5   : > { %v1455_v50 = vmul.f32 %v1454_v49, %v1454_v49 }
 0x8b7   : > { %v1456_v51 = vsel %vm578_vm0, %v1455_v50, 0.0 }
 0x8b8   : > { %1457 = vadd.xlane.f32.xlu0 %v1456_v51 }
 0x945   : > { %v1458_v2 = vpop.xlane.xlu0 %1457 }
 0x946   : > { %v1459_v3 = vmul.f32 0.03125, %v1458_v2 }
 0x948   : > { %v1460_v4 = vadd.f32 1e-05, %v1459_v3 }
 0x94a   : > { %2299 = vrsqrt.f32 %v1460_v4 }
 0x954   : > { %v2300_v5 = vpop.eup %2299 }
 0x955   : > { %v1462_v7 = vmul.f32 %v2300_v5, %v1454_v49 }
 0x957   : > { %v1469_v9 = vmul.f32 %v1898_v6, %v1462_v7 }
 0x959   : > { %v1476_v11 = vadd.f32 %v1899_v8, %v1469_v9 }
 0x95b   : > { %2026 = vmatmul.mubr.msk.f32.vlgmr.msra.gmra.mrb[14].mxu1 %vm578_vm0, %v1476_v11 }
 0xa2e   : > { %v1557_v29 = vpop.f32.mrb[14].mxu1 }
 0xa2f   : > { %v1558_v30 = vadd.f32 %v1900_v28, %v1557_v29  ;;  %v2027_v31 = vpop.f32.mrb[15].mxu1 }
 0xa31   : > { %v1563_v32 = vmul.f32 0.70710677, %v1558_v30  ;;  %v1561_v34 = vmul.f32 0.5, %v1558_v30 }
 0xa33   : > { %2301 = verf.f32 %v1563_v32 }
 0xa3d   : > { %v2302_v33 = vpop.eup %2301 }
 0xa3e   : > { %v1565_v35 = vadd.f32 1.0, %v2302_v33 }
 0xa40   : > { %v1566_v36 = vmul.f32 %v1565_v35, %v1561_v34 }
 0xa42   : > { %2061 = vmatmul.mubr.f32.vlgmr.msra.gmra.mrb[6].mxu0 %v1566_v36 }
 0xb15   : > { %v1656_v37 = vpop.f32.mrb[6].mxu0 }
 0xb16   : > { %v1657_v38 = vadd.f32 %v1902_v10, %v1656_v37  ;;  %v2062_v39 = vpop.f32.mrb[7].mxu0 }
 0xb18   : > { %v1660_v40 = vadd.f32 %v1657_v38, %v3293_v45 }
 0xb1a   : > { %1661 = vst.msk [vmem:[%s574_s25] sm:$0xff] %vm578_vm0, %v1660_v40 }
 0xb1b   : > { %2654 = shalt.err (!%p2651_p9)
}
 0xb1c   : > { %s2655_s16 = scalar_lea.hbm %s3315_s17, 128  ;;  %s2659_s25 = scalar_lea.hbm %s3414_s1, 256 }
 0xb1d   : > { %p2656_p7 = scmp.ne.s32.totalorder %s3315_s17, %s2655_s16  ;;  %p2660_p13 = scmp.lt.u32.totalorder %s3315_s17, %s3414_s1 }
 0xb1e   : > { %p2661_p1 = scmp.lt.u32.totalorder %s2659_s25, %s2655_s16  ;;  %p2663_p2 = scmp.lt.u32.totalorder %s2655_s16, %s3315_s17 }
 0xb1f   : > { %p2657_p10 = pnand %p2656_p7, %p3415_p0 }
 0xb20   : > { %p2662_p3 = por %p2661_p1, %p2660_p13 }
 0xb21   : > { %p2658_p4 = pneg %p2657_p10 }
 0xb22   : > { %p2664_p6 = por %p2663_p2, %p2662_p3 }
 0xb24   : > { %p2665_p11 = pnand %p2664_p6, %p2658_p4 }
 0xb26   : > { %2668 = shalt.err (!%p2665_p11)
}
 0xb27   : > { %2151 = dma.vmem_to_hbm [thread:$0]  (%p3415_p0), %s3317_s28, 128, %s3315_s17, %s1663_s27  }
 0xb28 PF: > { %s1688_s15 = sand.u32 1, %s2719_s21   ;;  %p3416_p12 = scmp.ne.s32.totalorder %s3398_s29, 0 }
 0xb29   : > { %p3417_p8 = scmp.ge.s32.totalorder %s2731_s24, 2  ;;  %s1689_s20 = scalar_lea.sflag [#allocation4], %s1688_s15 }
 0xb2b   : > { %p2192_p5 = pnand %p3417_p8, %p3416_p12 }
 0xb2d   : > { %2714 = dma.done.wait (!%p2192_p5), %s1689_s20, 128  }
 0xb2e   : > { %2716 = vsyncadd (!%p2192_p5), %s1689_s20, 4294967168  ;;  %p31_p9 = scmp.ge.s32.totalorder %s3110_s13, 4   ;;  %s3418_s21 = smov %s2723_s22 }
 0xb2f   : > { %s3419_s22 = smov %s2727_s23  ;;  %s3420_s23 = smov %s3122_s2 }
 0xb30   : > { %s3421_s24 = smov %s3110_s13  ;;  %33 = sbr.rel (!%p31_p9) target bundleno = 16 (0x10), region = 157 }
 0xb37   :  { %1694 = vsyncpa [#allocation3], 1 }
 0xb38   :  { %1696 = vsyncpa [#allocation3 + $0x1], 1 }
 0xb39   :  { %1697 = vsyncpa [#allocation6], 1 }
 0xb3a   :  { %1698 = vsyncpa [#allocation9], 1 }
 0xb3b   :  { %1699 = vsyncpa [#allocation12], 1 }
 0xb3c   :  { %1700 = vsyncpa [#allocation15], 1 }
 0xb3d   :  { %1701 = vsyncpa [#allocation18], 1 }
 0xb3e   :  { %1702 = vsyncpa [#allocation21], 1 }
 0xb3f   :  { %1703 = vsyncpa [#allocation4], 1 }
 0xb40   :  { %1705 = vsyncpa [#allocation4 + $0x1], 1 }

</bundles_post_ra>
